<compile_context>
chip_gen: v7x
topology: tpu7x:2x2x1
jax: 0.10.0
libtpu: 0.0.40
codegen_flags: <defaults>
</compile_context>

<pallas_src>
import jax
import jax.numpy as jnp
from jax.experimental import pallas as pl
from jax.experimental.pallas import tpu as pltpu


def _round_up(x, m):
    return (x + m - 1) // m * m


# -----------------------------------------------------------------------------
# Kernel
# -----------------------------------------------------------------------------
def _mlp_kernel(x_ref, w1_ref, w2_ref, w3_ref, w4_ref, w5_ref, w6_ref,
                aux_ref, o_ref):
    """Fused 6-layer MLP forward for one batch tile.

    x_ref : (TB, 64)  float32   (features zero-padded 60 -> 64)
    w*_ref: int8 weights in [in, out] layout (w1 K-padded to 64,
            w6 N-padded to 128 zero columns)
    aux   : (16, 512) float32   rows 0..5 = biases, rows 6..11 = per-output
                                -channel dequant scales (fc6 uses cols < 128)
    o_ref : (TB, 1)   float32   the single real output column
    """
    aux = aux_ref[...]

    def layer(h, w_ref, idx, ncols=512):
        # int8 -> bf16 cast of the quantized weights (VPU); the per-channel
        # scale is folded into the matmul output together with the bias.
        w = w_ref[...].astype(jnp.bfloat16)
        y = jnp.dot(h.astype(jnp.bfloat16), w,
                    preferred_element_type=jnp.float32)
        return y * aux[6 + idx:7 + idx, :ncols] + aux[idx:idx + 1, :ncols]

    # TODO(synk): nn.Dropout layers are identity here (eval()/inference
    # semantics); training-mode stochastic masking is not implemented.
    h = layer(x_ref[...], w1_ref, 0)                 # fc1 (reference: no ReLU)
    h = jnp.maximum(layer(h, w2_ref, 1), 0.0)        # fc2 -> dropout(id) -> relu
    h = jnp.maximum(layer(h, w3_ref, 2), 0.0)        # fc3 -> dropout(id) -> relu
    h = jnp.maximum(layer(h, w4_ref, 3), 0.0)        # fc4 -> dropout(id) -> relu
    h = jnp.maximum(layer(h, w5_ref, 4), 0.0)        # fc5 -> dropout(id) -> relu
    out = layer(h, w6_ref, 5, ncols=128)             # fc6: (TB, 128), col 0 real

    o_ref[...] = out[:, :1]                          # store only the real column


# -----------------------------------------------------------------------------
# Parameter construction / preparation
# -----------------------------------------------------------------------------
def init_params(key):
    """Deterministic PyTorch-style (uniform +-1/sqrt(fan_in)) init, f32 masters.
    Weights are stored [in, out] (transposed w.r.t. torch's [out, in])."""
    dims = [(60, 512), (512, 512), (512, 512), (512, 512), (512, 512), (512, 1)]
    params = []
    for i, (fin, fout) in enumerate(dims):
        kw, kb = jax.random.split(jax.random.fold_in(key, i))
        bound = 1.0 / (fin ** 0.5)
        w = jax.random.uniform(kw, (fin, fout), jnp.float32, -bound, bound)
        b = jax.random.uniform(kb, (1, fout), jnp.float32, -bound, bound)
        params.append((w, b))
    return params


def _quantize_per_channel(w):
    """Symmetric per-output-channel int8 quantization of an [in, out] matrix."""
    amax = jnp.max(jnp.abs(w), axis=0)
    scale = jnp.where(amax > 0, amax / 127.0, 1.0).astype(jnp.float32)
    q = jnp.clip(jnp.round(w / scale[None, :]), -127, 127).astype(jnp.int8)
    return q, scale


def prepare_params(params):
    """Master f32 params -> kernel layout:
       int8 weights (w1 K-padded 60->64, w6 N-padded 1->128) plus one packed
       (16, 512) f32 aux array: rows 0..5 biases, rows 6..11 dequant scales."""
    qs, scales, biases = [], [], []
    for (w, b) in params:
        q, s = _quantize_per_channel(w)
        qs.append(q)
        scales.append(s)
        biases.append(b[0])

    # fc1: pad the contraction dim 60 -> 64 (sublane aligned); zero rows exact.
    q1 = jnp.zeros((64, 512), jnp.int8).at[:60, :].set(qs[0])
    # fc6: pad the output dim 1 -> 128 lanes so the MXU sees a full-width matmul.
    q6 = jnp.zeros((512, 128), jnp.int8).at[:, :1].set(qs[5])

    aux = jnp.zeros((16, 512), jnp.float32)
    for i in range(5):
        aux = aux.at[i, :].set(biases[i])          # bias rows 0..4
        aux = aux.at[6 + i, :].set(scales[i])      # scale rows 6..10
    aux = aux.at[5, 0].set(biases[5][0])           # fc6 bias (col 0 only)
    aux = aux.at[11, :128].set(jnp.ones((128,), jnp.float32))
    aux = aux.at[11, 0].set(scales[5][0])          # fc6 scale (col 0 only)

    return (q1, qs[1], qs[2], qs[3], qs[4], q6), aux


# -----------------------------------------------------------------------------
# Wrapper
# -----------------------------------------------------------------------------
def net_forward(x, ws_q, aux):
    """x: (B, 60) float32 -> (B, 1) float32."""
    B, fin = x.shape
    kp = ws_q[0].shape[0]                       # 64 (padded fc1 contraction dim)

    # Batch tiling: one exact (8-aligned) tile for small B, 512-row tiles for
    # large B so the fixed per-grid-step overhead is well amortized.
    TB = min(512, _round_up(B, 8))
    Bp = _round_up(B, TB)
    n_tiles = Bp // TB

    xp = jnp.zeros((Bp, kp), jnp.float32).at[:B, :fin].set(x)

    # Megacore (v7x): only shard the grid across TensorCores when there are
    # enough tiles that halving compute beats duplicating the weight stream.
    sem = ("parallel",) if n_tiles > 4 else ("arbitrary",)

    const = lambda i: (0, 0)                    # weights / aux stay VMEM-resident
    in_specs = [
        pl.BlockSpec((TB, kp), lambda i: (i, 0)),   # x: tiled over the batch
        pl.BlockSpec(ws_q[0].shape, const),
        pl.BlockSpec(ws_q[1].shape, const),
        pl.BlockSpec(ws_q[2].shape, const),
        pl.BlockSpec(ws_q[3].shape, const),
        pl.BlockSpec(ws_q[4].shape, const),
        pl.BlockSpec(ws_q[5].shape, const),
        pl.BlockSpec(aux.shape, const),
    ]
    out_specs = pl.BlockSpec((TB, 1), lambda i: (i, 0))

    out = pl.pallas_call(
        _mlp_kernel,
        out_shape=jax.ShapeDtypeStruct((Bp, 1), jnp.float32),
        grid=(n_tiles,),
        in_specs=in_specs,
        out_specs=out_specs,
        compiler_params=pltpu.CompilerParams(dimension_semantics=sem),
    )(xp, *ws_q, aux)

    return out[:B]


# -----------------------------------------------------------------------------
# References
# -----------------------------------------------------------------------------
def ref_forward_quant(x, ws_q, aux):
    """Plain-JAX reference using the exact same int8/bf16/f32 math as the kernel."""
    kp = ws_q[0].shape[0]
    h = jnp.pad(x, ((0, 0), (0, kp - x.shape[1])))

    def layer(h, q, idx, ncols=512):
        y = jnp.dot(h.astype(jnp.bfloat16), q.astype(jnp.bfloat16),
                    preferred_element_type=jnp.float32)
        return y * aux[6 + idx, :ncols] + aux[idx, :ncols]

    h = layer(h, ws_q[0], 0)
    h = jnp.maximum(layer(h, ws_q[1], 1), 0.0)
    h = jnp.maximum(layer(h, ws_q[2], 2), 0.0)
    h = jnp.maximum(layer(h, ws_q[3], 3), 0.0)
    h = jnp.maximum(layer(h, ws_q[4], 4), 0.0)
    out = layer(h, ws_q[5], 5, ncols=128)
    return out[:, :1]


def ref_forward_f32(x, params):
    """Pure float32 reference of the original PyTorch forward (eval mode)."""
    hp = jax.lax.Precision.HIGHEST
    (w1, b1), (w2, b2), (w3, b3), (w4, b4), (w5, b5), (w6, b6) = params
    h = jnp.dot(x, w1, precision=hp) + b1
    h = jnp.maximum(jnp.dot(h, w2, precision=hp) + b2, 0.0)
    h = jnp.maximum(jnp.dot(h, w3, precision=hp) + b3, 0.0)
    h = jnp.maximum(jnp.dot(h, w4, precision=hp) + b4, 0.0)
    h = jnp.maximum(jnp.dot(h, w5, precision=hp) + b5, 0.0)
    return jnp.dot(h, w6, precision=hp) + b6


# -----------------------------------------------------------------------------
if __name__ == "__main__":
    key = jax.random.PRNGKey(0)
    k_params, k_x = jax.random.split(key)

    master_params = init_params(k_params)
    ws_q, aux = prepare_params(master_params)

    # Small single-tile case (the module's typical use) + a multi-tile case
    # that exercises row padding and the megacore-parallel grid path.
    for b in (8, 2600):
        x = jax.random.normal(jax.random.fold_in(k_x, b), (b, 60), jnp.float32)

        out = jax.block_until_ready(net_forward(x, ws_q, aux))
        assert out.shape == (b, 1), out.shape
        assert out.dtype == jnp.float32, out.dtype

        # 1) Kernel vs plain-JAX reference with identical quantized/bf16 math.
        ref_q = jax.block_until_ready(ref_forward_quant(x, ws_q, aux))
        err_q = float(jnp.max(jnp.abs(out - ref_q)))
        assert err_q < 2e-3, f"kernel vs quantized reference: max err {err_q}"

        # 2) Kernel vs pure-f32 reference: explicit int8+bf16 error budget.
        ref_f = jax.block_until_ready(ref_forward_f32(x, master_params))
        err_f = float(jnp.max(jnp.abs(out - ref_f)))
        assert err_f < 5e-2, f"kernel vs f32 reference: max err {err_f}"

    print("KERNEL_OK")
</pallas_src>

<mosaic_0001>
module attributes {stable_mosaic.version = 11 : i64} {
  func.func @_mlp_kernel(%arg0: i32, %arg1: memref<8x64xf32, #tpu.memory_space<vmem>>, %arg2: memref<64x512xi8, #tpu.memory_space<vmem>>, %arg3: memref<512x512xi8, #tpu.memory_space<vmem>>, %arg4: memref<512x512xi8, #tpu.memory_space<vmem>>, %arg5: memref<512x512xi8, #tpu.memory_space<vmem>>, %arg6: memref<512x512xi8, #tpu.memory_space<vmem>>, %arg7: memref<512x128xi8, #tpu.memory_space<vmem>>, %arg8: memref<16x512xf32, #tpu.memory_space<vmem>>, %arg9: memref<8x1xf32, #tpu.memory_space<vmem>>) attributes {dimension_semantics = [#tpu.dimension_semantics<arbitrary>], iteration_bounds = array<i64: 1>, scalar_prefetch = 0 : i64, scratch_operands = 0 : i64, tpu.core_type = #tpu.core_type<tc>, window_params = [{transform_indices = @transform_0, window_bounds = array<i64: 8, 64>}, {pipeline_mode = #tpu.pipeline_mode<synchronous>, transform_indices = @transform_1, window_bounds = array<i64: 64, 512>}, {pipeline_mode = #tpu.pipeline_mode<synchronous>, transform_indices = @transform_2, window_bounds = array<i64: 512, 512>}, {pipeline_mode = #tpu.pipeline_mode<synchronous>, transform_indices = @transform_3, window_bounds = array<i64: 512, 512>}, {pipeline_mode = #tpu.pipeline_mode<synchronous>, transform_indices = @transform_4, window_bounds = array<i64: 512, 512>}, {pipeline_mode = #tpu.pipeline_mode<synchronous>, transform_indices = @transform_5, window_bounds = array<i64: 512, 512>}, {pipeline_mode = #tpu.pipeline_mode<synchronous>, transform_indices = @transform_6, window_bounds = array<i64: 512, 128>}, {pipeline_mode = #tpu.pipeline_mode<synchronous>, transform_indices = @transform_7, window_bounds = array<i64: 16, 512>}, {transform_indices = @transform_8, window_bounds = array<i64: 8, 1>}]} {
    %c0 = arith.constant 0 : index
    %c0_0 = arith.constant 0 : index
    %0 = vector.load %arg8[%c0, %c0_0] : memref<16x512xf32, #tpu.memory_space<vmem>>, vector<16x512xf32>
    %c0_1 = arith.constant 0 : index
    %c0_2 = arith.constant 0 : index
    %1 = vector.load %arg1[%c0_1, %c0_2] : memref<8x64xf32, #tpu.memory_space<vmem>>, vector<8x64xf32>
    %c0_3 = arith.constant 0 : index
    %c0_4 = arith.constant 0 : index
    %2 = vector.load %arg2[%c0_3, %c0_4] : memref<64x512xi8, #tpu.memory_space<vmem>>, vector<64x512xi8>
    %3 = arith.sitofp %2 : vector<64x512xi8> to vector<64x512xbf16>
    %4 = arith.truncf %1 : vector<8x64xf32> to vector<8x64xbf16>
    %cst = arith.constant dense<0.000000e+00> : vector<8x512xf32>
    %5 = tpu.matmul %4, %3, %cst {dimension_numbers = #tpu.dot_dimension_numbers<[1], [0], [0], [1], [0, 0, 1, 1], [], []>} : vector<8x64xbf16>, vector<64x512xbf16>, vector<8x512xf32> -> vector<8x512xf32>
    %6 = vector.extract_strided_slice %0 {offsets = [6, 0], sizes = [1, 512], strides = [1, 1]} : vector<16x512xf32> to vector<1x512xf32>
    %7 = vector.broadcast %6 : vector<1x512xf32> to vector<8x512xf32>
    %8 = arith.mulf %5, %7 : vector<8x512xf32>
    %9 = vector.extract_strided_slice %0 {offsets = [0, 0], sizes = [1, 512], strides = [1, 1]} : vector<16x512xf32> to vector<1x512xf32>
    %10 = vector.broadcast %9 : vector<1x512xf32> to vector<8x512xf32>
    %11 = arith.addf %8, %10 : vector<8x512xf32>
    %c0_5 = arith.constant 0 : index
    %c0_6 = arith.constant 0 : index
    %12 = vector.load %arg3[%c0_5, %c0_6] : memref<512x512xi8, #tpu.memory_space<vmem>>, vector<512x512xi8>
    %13 = arith.sitofp %12 : vector<512x512xi8> to vector<512x512xbf16>
    %14 = arith.truncf %11 : vector<8x512xf32> to vector<8x512xbf16>
    %cst_7 = arith.constant dense<0.000000e+00> : vector<8x512xf32>
    %15 = tpu.matmul %14, %13, %cst_7 {dimension_numbers = #tpu.dot_dimension_numbers<[1], [0], [0], [1], [0, 0, 1, 1], [], []>} : vector<8x512xbf16>, vector<512x512xbf16>, vector<8x512xf32> -> vector<8x512xf32>
    %16 = vector.extract_strided_slice %0 {offsets = [7, 0], sizes = [1, 512], strides = [1, 1]} : vector<16x512xf32> to vector<1x512xf32>
    %17 = vector.broadcast %16 : vector<1x512xf32> to vector<8x512xf32>
    %18 = arith.mulf %15, %17 : vector<8x512xf32>
    %19 = vector.extract_strided_slice %0 {offsets = [1, 0], sizes = [1, 512], strides = [1, 1]} : vector<16x512xf32> to vector<1x512xf32>
    %20 = vector.broadcast %19 : vector<1x512xf32> to vector<8x512xf32>
    %21 = arith.addf %18, %20 : vector<8x512xf32>
    %cst_8 = arith.constant 0.000000e+00 : f32
    %22 = vector.broadcast %cst_8 : f32 to vector<8x512xf32>
    %23 = arith.maximumf %21, %22 : vector<8x512xf32>
    %c0_9 = arith.constant 0 : index
    %c0_10 = arith.constant 0 : index
    %24 = vector.load %arg4[%c0_9, %c0_10] : memref<512x512xi8, #tpu.memory_space<vmem>>, vector<512x512xi8>
    %25 = arith.sitofp %24 : vector<512x512xi8> to vector<512x512xbf16>
    %26 = arith.truncf %23 : vector<8x512xf32> to vector<8x512xbf16>
    %cst_11 = arith.constant dense<0.000000e+00> : vector<8x512xf32>
    %27 = tpu.matmul %26, %25, %cst_11 {dimension_numbers = #tpu.dot_dimension_numbers<[1], [0], [0], [1], [0, 0, 1, 1], [], []>} : vector<8x512xbf16>, vector<512x512xbf16>, vector<8x512xf32> -> vector<8x512xf32>
    %28 = vector.extract_strided_slice %0 {offsets = [8, 0], sizes = [1, 512], strides = [1, 1]} : vector<16x512xf32> to vector<1x512xf32>
    %29 = vector.broadcast %28 : vector<1x512xf32> to vector<8x512xf32>
    %30 = arith.mulf %27, %29 : vector<8x512xf32>
    %31 = vector.extract_strided_slice %0 {offsets = [2, 0], sizes = [1, 512], strides = [1, 1]} : vector<16x512xf32> to vector<1x512xf32>
    %32 = vector.broadcast %31 : vector<1x512xf32> to vector<8x512xf32>
    %33 = arith.addf %30, %32 : vector<8x512xf32>
    %cst_12 = arith.constant 0.000000e+00 : f32
    %34 = vector.broadcast %cst_12 : f32 to vector<8x512xf32>
    %35 = arith.maximumf %33, %34 : vector<8x512xf32>
    %c0_13 = arith.constant 0 : index
    %c0_14 = arith.constant 0 : index
    %36 = vector.load %arg5[%c0_13, %c0_14] : memref<512x512xi8, #tpu.memory_space<vmem>>, vector<512x512xi8>
    %37 = arith.sitofp %36 : vector<512x512xi8> to vector<512x512xbf16>
    %38 = arith.truncf %35 : vector<8x512xf32> to vector<8x512xbf16>
    %cst_15 = arith.constant dense<0.000000e+00> : vector<8x512xf32>
    %39 = tpu.matmul %38, %37, %cst_15 {dimension_numbers = #tpu.dot_dimension_numbers<[1], [0], [0], [1], [0, 0, 1, 1], [], []>} : vector<8x512xbf16>, vector<512x512xbf16>, vector<8x512xf32> -> vector<8x512xf32>
    %40 = vector.extract_strided_slice %0 {offsets = [9, 0], sizes = [1, 512], strides = [1, 1]} : vector<16x512xf32> to vector<1x512xf32>
    %41 = vector.broadcast %40 : vector<1x512xf32> to vector<8x512xf32>
    %42 = arith.mulf %39, %41 : vector<8x512xf32>
    %43 = vector.extract_strided_slice %0 {offsets = [3, 0], sizes = [1, 512], strides = [1, 1]} : vector<16x512xf32> to vector<1x512xf32>
    %44 = vector.broadcast %43 : vector<1x512xf32> to vector<8x512xf32>
    %45 = arith.addf %42, %44 : vector<8x512xf32>
    %cst_16 = arith.constant 0.000000e+00 : f32
    %46 = vector.broadcast %cst_16 : f32 to vector<8x512xf32>
    %47 = arith.maximumf %45, %46 : vector<8x512xf32>
    %c0_17 = arith.constant 0 : index
    %c0_18 = arith.constant 0 : index
    %48 = vector.load %arg6[%c0_17, %c0_18] : memref<512x512xi8, #tpu.memory_space<vmem>>, vector<512x512xi8>
    %49 = arith.sitofp %48 : vector<512x512xi8> to vector<512x512xbf16>
    %50 = arith.truncf %47 : vector<8x512xf32> to vector<8x512xbf16>
    %cst_19 = arith.constant dense<0.000000e+00> : vector<8x512xf32>
    %51 = tpu.matmul %50, %49, %cst_19 {dimension_numbers = #tpu.dot_dimension_numbers<[1], [0], [0], [1], [0, 0, 1, 1], [], []>} : vector<8x512xbf16>, vector<512x512xbf16>, vector<8x512xf32> -> vector<8x512xf32>
    %52 = vector.extract_strided_slice %0 {offsets = [10, 0], sizes = [1, 512], strides = [1, 1]} : vector<16x512xf32> to vector<1x512xf32>
    %53 = vector.broadcast %52 : vector<1x512xf32> to vector<8x512xf32>
    %54 = arith.mulf %51, %53 : vector<8x512xf32>
    %55 = vector.extract_strided_slice %0 {offsets = [4, 0], sizes = [1, 512], strides = [1, 1]} : vector<16x512xf32> to vector<1x512xf32>
    %56 = vector.broadcast %55 : vector<1x512xf32> to vector<8x512xf32>
    %57 = arith.addf %54, %56 : vector<8x512xf32>
    %cst_20 = arith.constant 0.000000e+00 : f32
    %58 = vector.broadcast %cst_20 : f32 to vector<8x512xf32>
    %59 = arith.maximumf %57, %58 : vector<8x512xf32>
    %c0_21 = arith.constant 0 : index
    %c0_22 = arith.constant 0 : index
    %60 = vector.load %arg7[%c0_21, %c0_22] : memref<512x128xi8, #tpu.memory_space<vmem>>, vector<512x128xi8>
    %61 = arith.sitofp %60 : vector<512x128xi8> to vector<512x128xbf16>
    %62 = arith.truncf %59 : vector<8x512xf32> to vector<8x512xbf16>
    %cst_23 = arith.constant dense<0.000000e+00> : vector<8x128xf32>
    %63 = tpu.matmul %62, %61, %cst_23 {dimension_numbers = #tpu.dot_dimension_numbers<[1], [0], [0], [1], [0, 0, 1, 1], [], []>} : vector<8x512xbf16>, vector<512x128xbf16>, vector<8x128xf32> -> vector<8x128xf32>
    %64 = vector.extract_strided_slice %0 {offsets = [11, 0], sizes = [1, 128], strides = [1, 1]} : vector<16x512xf32> to vector<1x128xf32>
    %65 = vector.broadcast %64 : vector<1x128xf32> to vector<8x128xf32>
    %66 = arith.mulf %63, %65 : vector<8x128xf32>
    %67 = vector.extract_strided_slice %0 {offsets = [5, 0], sizes = [1, 128], strides = [1, 1]} : vector<16x512xf32> to vector<1x128xf32>
    %68 = vector.broadcast %67 : vector<1x128xf32> to vector<8x128xf32>
    %69 = arith.addf %66, %68 : vector<8x128xf32>
    %70 = vector.extract_strided_slice %69 {offsets = [0, 0], sizes = [8, 1], strides = [1, 1]} : vector<8x128xf32> to vector<8x1xf32>
    %c0_24 = arith.constant 0 : index
    %c0_25 = arith.constant 0 : index
    %71 = vector.load %arg9[%c0_24, %c0_25] : memref<8x1xf32, #tpu.memory_space<vmem>>, vector<8x1xf32>
    tpu.vector_store %arg9[%c0_24, %c0_25], %70 {strides = array<i32>} : memref<8x1xf32, #tpu.memory_space<vmem>>, vector<8x1xf32>,
    return
  }
  func.func @transform_0(%arg0: i32) -> (i32, i32) {
    %c0_i32 = arith.constant 0 : i32
    %c0_i32_0 = arith.constant 0 : i32
    return %arg0, %c0_i32 : i32, i32
  }
  func.func @transform_1(%arg0: i32) -> (i32, i32) {
    %c0_i32 = arith.constant 0 : i32
    %c0_i32_0 = arith.constant 0 : i32
    %c0_i32_1 = arith.constant 0 : i32
    return %c0_i32, %c0_i32_0 : i32, i32
  }
  func.func @transform_2(%arg0: i32) -> (i32, i32) {
    %c0_i32 = arith.constant 0 : i32
    %c0_i32_0 = arith.constant 0 : i32
    %c0_i32_1 = arith.constant 0 : i32
    return %c0_i32, %c0_i32_0 : i32, i32
  }
  func.func @transform_3(%arg0: i32) -> (i32, i32) {
    %c0_i32 = arith.constant 0 : i32
    %c0_i32_0 = arith.constant 0 : i32
    %c0_i32_1 = arith.constant 0 : i32
    return %c0_i32, %c0_i32_0 : i32, i32
  }
  func.func @transform_4(%arg0: i32) -> (i32, i32) {
    %c0_i32 = arith.constant 0 : i32
    %c0_i32_0 = arith.constant 0 : i32
    %c0_i32_1 = arith.constant 0 : i32
    return %c0_i32, %c0_i32_0 : i32, i32
  }
  func.func @transform_5(%arg0: i32) -> (i32, i32) {
    %c0_i32 = arith.constant 0 : i32
    %c0_i32_0 = arith.constant 0 : i32
    %c0_i32_1 = arith.constant 0 : i32
    return %c0_i32, %c0_i32_0 : i32, i32
  }
  func.func @transform_6(%arg0: i32) -> (i32, i32) {
    %c0_i32 = arith.constant 0 : i32
    %c0_i32_0 = arith.constant 0 : i32
    %c0_i32_1 = arith.constant 0 : i32
    return %c0_i32, %c0_i32_0 : i32, i32
  }
  func.func @transform_7(%arg0: i32) -> (i32, i32) {
    %c0_i32 = arith.constant 0 : i32
    %c0_i32_0 = arith.constant 0 : i32
    %c0_i32_1 = arith.constant 0 : i32
    return %c0_i32, %c0_i32_0 : i32, i32
  }
  func.func @transform_8(%arg0: i32) -> (i32, i32) {
    %c0_i32 = arith.constant 0 : i32
    %c0_i32_0 = arith.constant 0 : i32
    return %arg0, %c0_i32 : i32, i32
  }
}

</mosaic_0001>

<bundles_post_ra>
// kernel: tpu_custom_call.1
= control target key start
LH: loop header
LB: loop body
LE: loop exit
PB: predicated region body
PF: predicated region fallthrough
CT: control target
= control target key end

     0   :  { %13 = vsyncpa [#allocation3], 0  ;;  %s2648_s0 = inlined_call_operand.hbm [shape: f32[8,64], index: 0, kind: input, shape index: {}]   ;;  %s2649_s1 = inlined_call_operand.hbm [shape: s8[64,512], index: 1, kind: input, shape index: {}]   ;;  %s2650_s2 = inlined_call_operand.hbm [shape: s8[512,512], index: 2, kind: input, shape index: {}]   ;;  %s2651_s3 = inlined_call_operand.hbm [shape: s8[512,512], index: 3, kind: input, shape index: {}]   ;;  %s2652_s4 = inlined_call_operand.hbm [shape: s8[512,512], index: 4, kind: input, shape index: {}]   ;;  %s2653_s5 = inlined_call_operand.hbm [shape: s8[512,512], index: 5, kind: input, shape index: {}]   ;;  %s2654_s6 = inlined_call_operand.hbm [shape: s8[512,128], index: 6, kind: input, shape index: {}]   ;;  %s2655_s7 = inlined_call_operand.hbm [shape: f32[16,512], index: 7, kind: input, shape index: {}]   ;;  %s2656_s8 = inlined_call_operand.vmem [shape: f32[8,1], index: 8, kind: output, shape index: {}]  }
   0x1   :  { %14 = vsyncpa [#allocation5], 0 }
   0x2   :  { %15 = vsyncpa [#allocation8], 0 }
   0x3   :  { %16 = vsyncpa [#allocation11], 0 }
   0x4   :  { %17 = vsyncpa [#allocation14], 0  ;;  %s2354_s27 = smov [#allocation4]   ;;  %s2168_s9 = scalar_lea.hbm %s2649_s1, 1024 }
   0x5   :  { %s33_s28 = sshll.u32 %s2354_s27, 4  ;;  %p2169_p0 = scmp.ne.s32.totalorder %s2649_s1, %s2168_s9  ;;  %s34_s28 = int_to_ptr.vmem [resolvable:$true] %s33_s28 }
   0x6   :  { %p2172_p1 = scmp.lt.u32.totalorder %s2168_s9, %s2649_s1 }
   0x8   :  { %p2174_p2 = pnand %p2172_p1, %p2169_p0 }
   0xa   :  { %2177 = shalt.err (!%p2174_p2)
}
   0xb   :  { %s2178_s14 = scalar_lea.vmem %s34_s28, 1024  ;;  %p2183_p4 = scmp.lt.s32.totalorder %s34_s28, %s34_s28 }
   0xc   :  { %p2179_p3 = scmp.ne.s32.totalorder %s34_s28, %s2178_s14  ;;  %p2184_p5 = scmp.lt.s32.totalorder %s2178_s14, %s2178_s14 }
   0xe   :  { %p2185_p6 = por %p2184_p5, %p2183_p4 }
  0x10   :  { %p2186_p7 = pnand %p2185_p6, %p2179_p3 }
  0x12   :  { %2189 = shalt.err (!%p2186_p7)
}
  0x13   :  { %s2355_s15 = smov 512   ;;  %s2356_s16 = smov 32  }
  0x14   :  { %39 = dma.hbm_to_vmem [thread:$0]  %s2649_s1, 1024, %s34_s28, [#allocation5], %s2355_s15, %s2355_s15, %s2356_s16  }
  0x15   :  { %s2357_s19 = smov [#allocation7]   ;;  %s2358_s21 = smov [#allocation10]  }
  0x16   :  { %s57_s20 = sshll.u32 %s2357_s19, 4  ;;  %s81_s22 = sshll.u32 %s2358_s21, 4  ;;  %s58_s20 = int_to_ptr.vmem [resolvable:$true] %s57_s20  ;;  %s82_s22 = int_to_ptr.vmem [resolvable:$true] %s81_s22 }
  0x17   :  { %s2190_s25 = scalar_lea.hbm %s2651_s3, 8192 }
  0x18   :  { %p2191_p8 = scmp.ne.s32.totalorder %s2651_s3, %s2190_s25  ;;  %p2194_p9 = scmp.lt.u32.totalorder %s2190_s25, %s2651_s3 }
  0x1a   :  { %p2196_p10 = pnand %p2194_p9, %p2191_p8 }
  0x1c   :  { %2199 = shalt.err (!%p2196_p10)
}
  0x1d   :  { %s2200_s1 = scalar_lea.vmem %s58_s20, 8192  ;;  %p2205_p12 = scmp.lt.s32.totalorder %s58_s20, %s58_s20 }
  0x1e   :  { %p2201_p11 = scmp.ne.s32.totalorder %s58_s20, %s2200_s1  ;;  %p2206_p13 = scmp.lt.s32.totalorder %s2200_s1, %s2200_s1 }
  0x20   :  { %p2207_p0 = por %p2206_p13, %p2205_p12 }
  0x22   :  { %p2208_p1 = pnand %p2207_p0, %p2201_p11 }
  0x24   :  { %2211 = shalt.err (!%p2208_p1)
}
  0x25   :  { %63 = dma.hbm_to_vmem [thread:$0]  %s2651_s3, 8192, %s58_s20, [#allocation8], %s2355_s15, %s2355_s15, %s2356_s16  }
  0x26   :  { %s2212_s12 = scalar_lea.hbm %s2653_s5, 8192 }
  0x27   :  { %p2213_p2 = scmp.ne.s32.totalorder %s2653_s5, %s2212_s12  ;;  %p2216_p3 = scmp.lt.u32.totalorder %s2212_s12, %s2653_s5 }
  0x29   :  { %p2218_p4 = pnand %p2216_p3, %p2213_p2 }
  0x2b   :  { %2221 = shalt.err (!%p2218_p4)
}
  0x2c   :  { %s2222_s19 = scalar_lea.vmem %s82_s22, 8192  ;;  %p2227_p6 = scmp.lt.s32.totalorder %s82_s22, %s82_s22 }
  0x2d   :  { %p2223_p5 = scmp.ne.s32.totalorder %s82_s22, %s2222_s19  ;;  %p2228_p7 = scmp.lt.s32.totalorder %s2222_s19, %s2222_s19 }
  0x2f   :  { %p2229_p8 = por %p2228_p7, %p2227_p6 }
  0x31   :  { %p2230_p9 = pnand %p2229_p8, %p2223_p5 }
  0x33   :  { %2233 = shalt.err (!%p2230_p9)
}
  0x34   :  { %87 = dma.hbm_to_vmem [thread:$0]  %s2653_s5, 8192, %s82_s22, [#allocation11], %s2355_s15, %s2355_s15, %s2356_s16  }
  0x35   :  { %s2359_s21 = smov [#allocation2]   ;;  %s2360_s24 = smov [#allocation6]  }
  0x36   :  { %s24_s23 = sshll.u32 %s2359_s21, 4  ;;  %s45_s25 = sshll.u32 %s2360_s24, 4  ;;  %s25_s23 = int_to_ptr.vmem [resolvable:$true] %s24_s23  ;;  %s46_s25 = int_to_ptr.vmem [resolvable:$true] %s45_s25 }
  0x37   :  { %s2234_s29 = scalar_lea.hbm %s2648_s0, 128 }
  0x38   :  { %p2235_p10 = scmp.ne.s32.totalorder %s2648_s0, %s2234_s29  ;;  %p2238_p11 = scmp.lt.u32.totalorder %s2234_s29, %s2648_s0 }
  0x3a   :  { %p2240_p12 = pnand %p2238_p11, %p2235_p10 }
  0x3c   :  { %2243 = shalt.err (!%p2240_p12)
}
  0x3d   :  { %s2244_s5 = scalar_lea.vmem %s25_s23, 128  ;;  %p2249_p0 = scmp.lt.s32.totalorder %s25_s23, %s25_s23 }
  0x3e   :  { %p2245_p13 = scmp.ne.s32.totalorder %s25_s23, %s2244_s5  ;;  %p2250_p1 = scmp.lt.s32.totalorder %s2244_s5, %s2244_s5 }
  0x40   :  { %p2251_p2 = por %p2250_p1, %p2249_p0 }
  0x42   :  { %p2252_p3 = pnand %p2251_p2, %p2245_p13 }
  0x44   :  { %2255 = shalt.err (!%p2252_p3)
}
  0x45   :  { %27 = dma.hbm_to_vmem [thread:$0]  %s2648_s0, 128, %s25_s23, [#allocation3]  }
  0x46   :  { %s2256_s13 = scalar_lea.hbm %s2650_s2, 8192 }
  0x47   :  { %p2257_p4 = scmp.ne.s32.totalorder %s2650_s2, %s2256_s13  ;;  %p2260_p5 = scmp.lt.u32.totalorder %s2256_s13, %s2650_s2 }
  0x49   :  { %p2262_p6 = pnand %p2260_p5, %p2257_p4 }
  0x4b   :  { %2265 = shalt.err (!%p2262_p6)
}
  0x4c   :  { %s2266_s3 = scalar_lea.vmem %s46_s25, 8192  ;;  %p2271_p8 = scmp.lt.s32.totalorder %s46_s25, %s46_s25 }
  0x4d   :  { %p2267_p7 = scmp.ne.s32.totalorder %s46_s25, %s2266_s3  ;;  %p2272_p9 = scmp.lt.s32.totalorder %s2266_s3, %s2266_s3 }
  0x4f   :  { %p2273_p10 = por %p2272_p9, %p2271_p8 }
  0x51   :  { %p2274_p11 = pnand %p2273_p10, %p2267_p7 }
  0x53   :  { %2277 = shalt.err (!%p2274_p11)
}
  0x54   :  { %51 = dma.hbm_to_vmem [thread:$0]  %s2650_s2, 8192, %s46_s25, [#allocation5], %s2355_s15, %s2355_s15, %s2356_s16  }
  0x55   :  { %s2361_s21 = smov [#allocation9]   ;;  %s2362_s24 = smov [#allocation12]  }
  0x56   :  { %s69_s23 = sshll.u32 %s2361_s21, 4  ;;  %s93_s26 = sshll.u32 %s2362_s24, 4  ;;  %s70_s23 = int_to_ptr.vmem [resolvable:$true] %s69_s23  ;;  %s94_s26 = int_to_ptr.vmem [resolvable:$true] %s93_s26 }
  0x57   :  { %s2278_s30 = scalar_lea.hbm %s2652_s4, 8192 }
  0x58   :  { %p2279_p12 = scmp.ne.s32.totalorder %s2652_s4, %s2278_s30  ;;  %p2282_p13 = scmp.lt.u32.totalorder %s2278_s30, %s2652_s4 }
  0x5a   :  { %p2284_p0 = pnand %p2282_p13, %p2279_p12 }
  0x5c   :  { %2287 = shalt.err (!%p2284_p0)
}
  0x5d   :  { %s2288_s2 = scalar_lea.vmem %s70_s23, 8192  ;;  %p2293_p2 = scmp.lt.s32.totalorder %s70_s23, %s70_s23 }
  0x5e   :  { %p2289_p1 = scmp.ne.s32.totalorder %s70_s23, %s2288_s2  ;;  %p2294_p3 = scmp.lt.s32.totalorder %s2288_s2, %s2288_s2 }
  0x60   :  { %p2295_p4 = por %p2294_p3, %p2293_p2 }
  0x62   :  { %p2296_p5 = pnand %p2295_p4, %p2289_p1 }
  0x64   :  { %2299 = shalt.err (!%p2296_p5)
}
  0x65   :  { %75 = dma.hbm_to_vmem [thread:$0]  %s2652_s4, 8192, %s70_s23, [#allocation8], %s2355_s15, %s2355_s15, %s2356_s16  }
  0x66   :  { %s2300_s12 = scalar_lea.hbm %s2654_s6, 2048 }
  0x67   :  { %p2301_p6 = scmp.ne.s32.totalorder %s2654_s6, %s2300_s12  ;;  %p2304_p7 = scmp.lt.u32.totalorder %s2300_s12, %s2654_s6 }
  0x69   :  { %p2306_p8 = pnand %p2304_p7, %p2301_p6 }
  0x6b   :  { %2309 = shalt.err (!%p2306_p8)
}
  0x6c   :  { %s2310_s19 = scalar_lea.vmem %s94_s26, 2048  ;;  %p2315_p10 = scmp.lt.s32.totalorder %s94_s26, %s94_s26 }
  0x6d   :  { %p2311_p9 = scmp.ne.s32.totalorder %s94_s26, %s2310_s19  ;;  %p2316_p11 = scmp.lt.s32.totalorder %s2310_s19, %s2310_s19 }
  0x6f   :  { %p2317_p12 = por %p2316_p11, %p2315_p10 }
  0x71   :  { %p2318_p13 = pnand %p2317_p12, %p2311_p9 }
  0x73   :  { %2321 = shalt.err (!%p2318_p13)
}
  0x74   :  { %s2363_s4 = smov 128   ;;  %s2364_s3 = smov 8  }
  0x75   :  { %99 = dma.hbm_to_vmem [thread:$0]  %s2654_s6, 2048, %s94_s26, [#allocation11], %s2363_s4, %s2363_s4, %s2364_s3  }
  0x76   :  { %s2365_s21 = smov [#allocation13]   ;;  %s2322_s29 = scalar_lea.hbm %s2655_s7, 1024 }
  0x77   :  { %s105_s23 = sshll.u32 %s2365_s21, 4  ;;  %p2323_p0 = scmp.ne.s32.totalorder %s2655_s7, %s2322_s29  ;;  %s106_s23 = int_to_ptr.vmem [resolvable:$true] %s105_s23 }
  0x78   :  { %p2326_p1 = scmp.lt.u32.totalorder %s2322_s29, %s2655_s7 }
  0x7a   :  { %p2328_p2 = pnand %p2326_p1, %p2323_p0 }
  0x7c   :  { %2331 = shalt.err (!%p2328_p2)
}
  0x7d   :  { %s2332_s5 = scalar_lea.vmem %s106_s23, 1024  ;;  %p2337_p4 = scmp.lt.s32.totalorder %s106_s23, %s106_s23 }
  0x7e   :  { %p2333_p3 = scmp.ne.s32.totalorder %s106_s23, %s2332_s5  ;;  %p2338_p5 = scmp.lt.s32.totalorder %s2332_s5, %s2332_s5 }
  0x80   :  { %p2339_p6 = por %p2338_p5, %p2337_p4 }
  0x82   :  { %p2340_p7 = pnand %p2339_p6, %p2333_p3 }
  0x84   :  { %2343 = shalt.err (!%p2340_p7)
}
  0x85   :  { %111 = dma.hbm_to_vmem [thread:$0]  %s2655_s7, 1024, %s106_s23, [#allocation14], %s2355_s15, %s2355_s15, %s2356_s16  }
  0x86   :  { %2344 = dma.done.wait [#allocation3], 128  }
  0x87   :  { %2345 = vsyncadd [#allocation3], 4294967168 }
  0x88   :  { %2346 = dma.done.wait [#allocation5], 9216  }
  0x89   :  { %2347 = vsyncadd [#allocation5], 4294958080 }
  0x8a   :  { %2348 = dma.done.wait [#allocation8], 16384  }
  0x8b   :  { %2349 = vsyncadd [#allocation8], 4294950912 }
  0x8c   :  { %2350 = dma.done.wait [#allocation11], 10240  }
  0x8d   :  { %2351 = vsyncadd [#allocation11], 4294957056 }
  0x8e   :  { %2352 = dma.done.wait [#allocation14], 1024  }
  0x8f   :  { %2353 = vsyncadd [#allocation14], 4294966272  ;;  %v2366_v0 = vmov 0   ;;  %v147_v1 = vld [vmem:[#allocation4 + $0x8] sm:$0xff]  ;;  %v146_v2 = vld [vmem:[#allocation4] sm:$0xff]  ;;  %vm171_vm0 = vcmask 523264  }
  0x90   :  { %207 = vmatprep.mubr.bf16.mxu0 %v2366_v0  ;;  %248 = vmatprep.mubr.bf16.mxu1 %v2366_v0  ;;  %v155_v3 = vunpack.c.l.s8.bf16 %v147_v1  ;;  %v159_v4 = vunpack.c.h.s8.bf16 %v147_v1  ;;  %v154_v5 = vunpack.c.l.s8.bf16 %v146_v2  ;;  %v149_v6 = vld [vmem:[#allocation4 + $0x18] sm:$0xff]  ;;  %v151_v7 = vld [vmem:[#allocation4 + $0x28] sm:$0xff]  ;;  %v148_v8 = vld [vmem:[#allocation4 + $0x10] sm:$0xff]  ;;  %v158_v12 = vunpack.c.h.s8.bf16 %v146_v2 }
  0x91   :  { %v157_v9 = vunpack.c.l.s8.bf16 %v149_v6  ;;  %v161_v10 = vunpack.c.h.s8.bf16 %v149_v6  ;;  %v156_v11 = vunpack.c.l.s8.bf16 %v148_v8  ;;  %v153_v13 = vld [vmem:[#allocation4 + $0x38] sm:$0xff]  ;;  %v163_v14 = vunpack.c.l.s8.bf16 %v151_v7  ;;  %v150_v15 = vld [vmem:[#allocation4 + $0x20] sm:$0xff]  ;;  %v152_v18 = vld [vmem:[#allocation4 + $0x30] sm:$0xff] }
  0x92   :  { %175 = vmatprep.subr.bf16.mxu0 %v155_v3  ;;  %v160_v16 = vunpack.c.h.s8.bf16 %v148_v8  ;;  %v165_v17 = vunpack.c.l.s8.bf16 %v153_v13  ;;  %v162_v19 = vunpack.c.l.s8.bf16 %v150_v15  ;;  %v167_v20 = vunpack.c.h.s8.bf16 %v151_v7  ;;  %v298_v22 = vld [vmem:[#allocation6 + $0x8] sm:$0xff]  ;;  %v145_v25 = vld [vmem:[#allocation2] sm:$0xff]  ;;  %v297_v28 = vld [vmem:[#allocation6] sm:$0xff] }
  0x93   :  { %176 = vmatpush1.bf16.msra.mxu0 %v154_v5  ;;  %216 = vmatprep.subr.bf16.mxu1 %v157_v9  ;;  %v164_v21 = vunpack.c.l.s8.bf16 %v152_v18  ;;  %v169_v23 = vunpack.c.h.s8.bf16 %v153_v13  ;;  %v166_v24 = vunpack.c.h.s8.bf16 %v150_v15  ;;  %v300_v26 = vld [vmem:[#allocation6 + $0x18] sm:$0xff]  ;;  %v362_v27 = vunpack.c.l.s8.bf16 %v298_v22  ;;  %v299_v32 = vld [vmem:[#allocation6 + $0x10] sm:$0xff]  ;;  %v302_v36 = vld [vmem:[#allocation6 + $0x28] sm:$0xff] }
  0x94   :  { %177 = vmatprep.subr.bf16.mxu0 %v159_v4  ;;  %217 = vmatpush1.bf16.msra.mxu1 %v156_v11  ;;  %v168_v29 = vunpack.c.h.s8.bf16 %v152_v18  ;;  %v170_v30 = vpack.c.bf16 %v145_v25, %v145_v25  ;;  %v364_v31 = vunpack.c.l.s8.bf16 %v300_v26  ;;  %v361_v33 = vunpack.c.l.s8.bf16 %v297_v28  ;;  %v304_v39 = vld [vmem:[#allocation6 + $0x38] sm:$0xff]  ;;  %v301_v41 = vld [vmem:[#allocation6 + $0x20] sm:$0xff]  ;;  %v303_v44 = vld [vmem:[#allocation6 + $0x30] sm:$0xff] }
  0x95   :  { %218 = vmatprep.subr.bf16.mxu1 %v161_v10  ;;  %v366_v34 = vunpack.c.h.s8.bf16 %v298_v22  ;;  %v363_v35 = vunpack.c.l.s8.bf16 %v299_v32  ;;  %v368_v37 = vunpack.c.h.s8.bf16 %v300_v26  ;;  %v365_v38 = vunpack.c.h.s8.bf16 %v297_v28  ;;  %v306_v48 = vld [vmem:[#allocation6 + $0x48] sm:$0xff]  ;;  %v308_v51 = vld [vmem:[#allocation6 + $0x58] sm:$0xff]  ;;  %v305_v53 = vld [vmem:[#allocation6 + $0x40] sm:$0xff] }
  0x96   :  { %v370_v40 = vunpack.c.l.s8.bf16 %v302_v36  ;;  %v367_v42 = vunpack.c.h.s8.bf16 %v299_v32  ;;  %v372_v43 = vunpack.c.l.s8.bf16 %v304_v39  ;;  %v369_v45 = vunpack.c.l.s8.bf16 %v301_v41  ;;  %v307_v56 = vld [vmem:[#allocation6 + $0x50] sm:$0xff]  ;;  %v310_v60 = vld [vmem:[#allocation6 + $0x68] sm:$0xff]  ;;  %v312_v63 = vld [vmem:[#allocation6 + $0x78] sm:$0xff] }
  0x97   :  { %178 = vmatpush1.bf16.msra.mxu0 %v158_v12  ;;  %v374_v46 = vunpack.c.h.s8.bf16 %v302_v36  ;;  %v371_v47 = vunpack.c.l.s8.bf16 %v303_v44  ;;  %v376_v49 = vunpack.c.h.s8.bf16 %v304_v39  ;;  %v373_v50 = vunpack.c.h.s8.bf16 %v301_v41  ;;  %v309_v1 = vld [vmem:[#allocation6 + $0x60] sm:$0xff]  ;;  %v311_v4 = vld [vmem:[#allocation6 + $0x70] sm:$0xff]  ;;  %v314_v8 = vld [vmem:[#allocation6 + $0x88] sm:$0xff] }
  0x98   :  { %179 = vmatprep.subr.bf16.mxu0 %v163_v14  ;;  %219 = vmatpush1.bf16.msra.mxu1 %v160_v16  ;;  %v378_v52 = vunpack.c.l.s8.bf16 %v306_v48  ;;  %v375_v54 = vunpack.c.h.s8.bf16 %v303_v44  ;;  %v380_v55 = vunpack.c.l.s8.bf16 %v308_v51  ;;  %v377_v57 = vunpack.c.l.s8.bf16 %v305_v53  ;;  %v316_v11 = vld [vmem:[#allocation6 + $0x98] sm:$0xff]  ;;  %v313_v13 = vld [vmem:[#allocation6 + $0x80] sm:$0xff]  ;;  %v315_v16 = vld [vmem:[#allocation6 + $0x90] sm:$0xff] }
  0x99   :  { %220 = vmatprep.subr.bf16.mxu1 %v165_v17  ;;  %v382_v58 = vunpack.c.h.s8.bf16 %v306_v48  ;;  %v379_v59 = vunpack.c.l.s8.bf16 %v307_v56  ;;  %v384_v61 = vunpack.c.h.s8.bf16 %v308_v51  ;;  %v381_v62 = vunpack.c.h.s8.bf16 %v305_v53  ;;  %v317_v25 = vld [vmem:[#allocation6 + $0xa0] sm:$0xff]  ;;  %v319_v28 = vld [vmem:[#allocation6 + $0xb0] sm:$0xff]  ;;  %v322_v32 = vld [vmem:[#allocation6 + $0xc8] sm:$0xff] }
  0x9a   :  { %v386_v0 = vunpack.c.l.s8.bf16 %v310_v60  ;;  %v383_v2 = vunpack.c.h.s8.bf16 %v307_v56  ;;  %v388_v3 = vunpack.c.l.s8.bf16 %v312_v63  ;;  %v385_v5 = vunpack.c.l.s8.bf16 %v309_v1  ;;  %v328_v48 = vld [vmem:[#allocation6 + $0xf8] sm:$0xff]  ;;  %v325_v51 = vld [vmem:[#allocation6 + $0xe0] sm:$0xff] }
  0x9b   :  { %180 = vmatpush1.bf16.msra.mxu0 %v162_v19  ;;  %v390_v6 = vunpack.c.h.s8.bf16 %v310_v60  ;;  %v387_v7 = vunpack.c.l.s8.bf16 %v311_v4  ;;  %v392_v9 = vunpack.c.h.s8.bf16 %v312_v63  ;;  %v389_v10 = vunpack.c.h.s8.bf16 %v309_v1  ;;  %v332_v60 = vld [vmem:[#allocation6 + $0x118] sm:$0xff] }
  0x9c   :  { %181 = vmatprep.subr.bf16.mxu0 %v167_v20  ;;  %221 = vmatpush1.bf16.msra.mxu1 %v164_v21  ;;  %v394_v12 = vunpack.c.l.s8.bf16 %v314_v8  ;;  %v391_v14 = vunpack.c.h.s8.bf16 %v311_v4  ;;  %v396_v15 = vunpack.c.l.s8.bf16 %v316_v11  ;;  %v393_v17 = vunpack.c.l.s8.bf16 %v313_v13  ;;  %v318_v20 = vld [vmem:[#allocation6 + $0xa8] sm:$0xff] }
  0x9d   :  { %222 = vmatprep.subr.bf16.mxu1 %v169_v23  ;;  %v398_v18 = vunpack.c.h.s8.bf16 %v314_v8  ;;  %v395_v19 = vunpack.c.l.s8.bf16 %v315_v16  ;;  %v400_v21 = vunpack.c.h.s8.bf16 %v316_v11  ;;  %v397_v22 = vunpack.c.h.s8.bf16 %v313_v13  ;;  %v320_v23 = vld [vmem:[#allocation6 + $0xb8] sm:$0xff]  ;;  %v2534_v4 = vld [vmem:[#allocation13 + $0x8] sm:$0xff] }
  0x9e   :  { %v399_v26 = vunpack.c.h.s8.bf16 %v315_v16  ;;  %v410_v36 = vunpack.c.l.s8.bf16 %v322_v32  ;;  %v417_v53 = vunpack.c.l.s8.bf16 %v325_v51  ;;  %v424_v56 = vunpack.c.h.s8.bf16 %v328_v48 }
  0x9f   :  { %182 = vmatpush1.bf16.msra.mxu0 %v166_v24  ;;  %v402_v24 = vunpack.c.l.s8.bf16 %v318_v20  ;;  %v257_v63 = vlaneseq  ;;  %vm2055_vm1 = vcmask 7168  }
  0xa0   :  { %493 = vmatprep.subr.bf16.mxu0 %v362_v27  ;;  %223 = vmatpush1.bf16.msra.mxu1 %v168_v29  ;;  %v404_v27 = vunpack.c.l.s8.bf16 %v320_v23  ;;  %v401_v29 = vunpack.c.l.s8.bf16 %v317_v25 }
  0xa1   :  { %575 = vmatprep.subr.bf16.mxu1 %v364_v31  ;;  %v403_v31 = vunpack.c.l.s8.bf16 %v319_v28 }
  0xa2   :  { %2066 = vmatmul.mubr.msk.bf16.vlgmr.msra.gmra.mrb[0].mxu0 %vm171_vm0, %v170_v30 }
  0xa3   :  { %494 = vmatpush1.bf16.msra.mxu0 %v361_v33  ;;  %2067 = vmatmul.mubr.msk.bf16.vlgmr.msra.gmra.mrb[0].mxu1 %vm171_vm0, %v170_v30  ;;  %v406_v30 = vunpack.c.h.s8.bf16 %v318_v20  ;;  %v408_v33 = vunpack.c.h.s8.bf16 %v320_v23  ;;  %v331_v23 = vld [vmem:[#allocation6 + $0x110] sm:$0xff] }
  0xa4   :  { %495 = vmatprep.subr.bf16.mxu0 %v366_v34  ;;  %576 = vmatpush1.bf16.msra.mxu1 %v363_v35  ;;  %v405_v34 = vunpack.c.h.s8.bf16 %v317_v25  ;;  %v324_v35 = vld [vmem:[#allocation6 + $0xd8] sm:$0xff] }
  0xa5   :  { %577 = vmatprep.subr.bf16.mxu1 %v368_v37  ;;  %v321_v37 = vld [vmem:[#allocation6 + $0xc0] sm:$0xff]  ;;  %v412_v39 = vunpack.c.l.s8.bf16 %v324_v35  ;;  %v416_v44 = vunpack.c.h.s8.bf16 %v324_v35 }
  0xa6   :  { %v409_v41 = vunpack.c.l.s8.bf16 %v321_v37 }
  0xa7   :  { %496 = vmatpush1.bf16.msra.mxu0 %v365_v38  ;;  %v407_v38 = vunpack.c.h.s8.bf16 %v319_v28 }
  0xa8   :  { %497 = vmatprep.subr.bf16.mxu0 %v370_v40  ;;  %578 = vmatpush1.bf16.msra.mxu1 %v367_v42  ;;  %v323_v40 = vld [vmem:[#allocation6 + $0xd0] sm:$0xff]  ;;  %v414_v42 = vunpack.c.h.s8.bf16 %v322_v32  ;;  %v427_v32 = vunpack.c.l.s8.bf16 %v331_v23 }
  0xa9   :  { %579 = vmatprep.subr.bf16.mxu1 %v372_v43  ;;  %v411_v43 = vunpack.c.l.s8.bf16 %v323_v40 }
  0xab   :  { %498 = vmatpush1.bf16.msra.mxu0 %v369_v45  ;;  %v413_v45 = vunpack.c.h.s8.bf16 %v321_v37  ;;  %v334_v37 = vld [vmem:[#allocation6 + $0x128] sm:$0xff] }
  0xac   :  { %499 = vmatprep.subr.bf16.mxu0 %v374_v46  ;;  %580 = vmatpush1.bf16.msra.mxu1 %v371_v47  ;;  %v415_v46 = vunpack.c.h.s8.bf16 %v323_v40  ;;  %v326_v47 = vld [vmem:[#allocation6 + $0xe8] sm:$0xff] }
  0xad   :  { %581 = vmatprep.subr.bf16.mxu1 %v376_v49  ;;  %v418_v49 = vunpack.c.l.s8.bf16 %v326_v47 }
  0xaf   :  { %500 = vmatpush1.bf16.msra.mxu0 %v373_v50  ;;  %v420_v50 = vunpack.c.l.s8.bf16 %v328_v48  ;;  %v438_v48 = vunpack.c.h.s8.bf16 %v334_v37 }
  0xb0   :  { %501 = vmatprep.subr.bf16.mxu0 %v378_v52  ;;  %582 = vmatpush1.bf16.msra.mxu1 %v375_v54  ;;  %v327_v52 = vld [vmem:[#allocation6 + $0xf0] sm:$0xff] }
  0xb1   :  { %583 = vmatprep.subr.bf16.mxu1 %v380_v55  ;;  %v419_v54 = vunpack.c.l.s8.bf16 %v327_v52  ;;  %v422_v55 = vunpack.c.h.s8.bf16 %v326_v47 }
  0xb3   :  { %502 = vmatpush1.bf16.msra.mxu0 %v377_v57  ;;  %v421_v57 = vunpack.c.h.s8.bf16 %v325_v51  ;;  %v340_v51 = vld [vmem:[#allocation6 + $0x158] sm:$0xff] }
  0xb4   :  { %503 = vmatprep.subr.bf16.mxu0 %v382_v58  ;;  %584 = vmatpush1.bf16.msra.mxu1 %v379_v59  ;;  %v423_v58 = vunpack.c.h.s8.bf16 %v327_v52  ;;  %v330_v59 = vld [vmem:[#allocation6 + $0x108] sm:$0xff] }
  0xb5   :  { %585 = vmatprep.subr.bf16.mxu1 %v384_v61  ;;  %v426_v61 = vunpack.c.l.s8.bf16 %v330_v59  ;;  %v430_v35 = vunpack.c.h.s8.bf16 %v330_v59 }
  0xb7   :  { %504 = vmatpush1.bf16.msra.mxu0 %v381_v62  ;;  %v428_v62 = vunpack.c.l.s8.bf16 %v332_v60 }
  0xb8   :  { %505 = vmatprep.subr.bf16.mxu0 %v386_v0  ;;  %586 = vmatpush1.bf16.msra.mxu1 %v383_v2  ;;  %v2526_v0 = vshrl.u32 %v257_v63, 7  ;;  %v2529_v2 = vld [vmem:[#allocation13] sm:$0xff]  ;;  %v344_v63 = vld [vmem:[#allocation6 + $0x178] sm:$0xff] }
  0xb9   :  { %587 = vmatprep.subr.bf16.mxu1 %v388_v3 }
  0xba   :  { %v259_v1 = vsub.s32 6, %v2526_v0  ;;  %v2532_v3 = vsub.s32 0, %v2526_v0 }
  0xbb   :  { %506 = vmatpush1.bf16.msra.mxu0 %v385_v5  ;;  %v2536_v5 = vld [vmem:[#allocation13 + $0x10] sm:$0xff] }
  0xbc   :  { %507 = vmatprep.subr.bf16.mxu0 %v390_v6  ;;  %588 = vmatpush1.bf16.msra.mxu1 %v387_v7  ;;  %v260_v6 = vrot.slane %v2529_v2, %v259_v1  ;;  %v2539_v7 = vld [vmem:[#allocation13 + $0x18] sm:$0xff]  ;;  %v264_v8 = vrot.slane %v2534_v4, %v259_v1 }
  0xbd   :  { %589 = vmatprep.subr.bf16.mxu1 %v392_v9  ;;  %v280_v9 = vrot.slane %v2529_v2, %v2532_v3  ;;  %v272_v13 = vrot.slane %v2539_v7, %v259_v1 }
  0xbf   :  { %508 = vmatpush1.bf16.msra.mxu0 %v389_v10  ;;  %v268_v10 = vrot.slane %v2536_v5, %v259_v1 }
  0xc0   :  { %509 = vmatprep.subr.bf16.mxu0 %v394_v12  ;;  %590 = vmatpush1.bf16.msra.mxu1 %v391_v14  ;;  %v284_v12 = vrot.slane %v2534_v4, %v2532_v3 }
  0xc1   :  { %591 = vmatprep.subr.bf16.mxu1 %v396_v15 }
  0xc3   :  { %510 = vmatpush1.bf16.msra.mxu0 %v393_v17 }
  0xc4   :  { %511 = vmatprep.subr.bf16.mxu0 %v398_v18  ;;  %592 = vmatpush1.bf16.msra.mxu1 %v395_v19  ;;  %v292_v19 = vrot.slane %v2539_v7, %v2532_v3 }
  0xc5   :  { %593 = vmatprep.subr.bf16.mxu1 %v400_v21 }
  0xc7   :  { %512 = vmatpush1.bf16.msra.mxu0 %v397_v22  ;;  %v329_v22 = vld [vmem:[#allocation6 + $0x100] sm:$0xff] }
  0xc8   :  { %513 = vmatprep.subr.bf16.mxu0 %v402_v24  ;;  %594 = vmatpush1.bf16.msra.mxu1 %v399_v26  ;;  %v429_v40 = vunpack.c.h.s8.bf16 %v329_v22 }
  0xc9   :  { %595 = vmatprep.subr.bf16.mxu1 %v404_v27 }
  0xcb   :  { %514 = vmatpush1.bf16.msra.mxu0 %v401_v29 }
  0xcc   :  { %515 = vmatprep.subr.bf16.mxu0 %v406_v30  ;;  %596 = vmatpush1.bf16.msra.mxu1 %v403_v31  ;;  %v425_v31 = vunpack.c.l.s8.bf16 %v329_v22  ;;  %v345_v22 = vld [vmem:[#allocation6 + $0x180] sm:$0xff] }
  0xcd   :  { %597 = vmatprep.subr.bf16.mxu1 %v408_v33 }
  0xcf   :  { %516 = vmatpush1.bf16.msra.mxu0 %v405_v34 }
  0xd0   :  { %517 = vmatprep.subr.bf16.mxu0 %v410_v36  ;;  %598 = vmatpush1.bf16.msra.mxu1 %v407_v38  ;;  %v432_v36 = vunpack.c.h.s8.bf16 %v332_v60  ;;  %v336_v38 = vld [vmem:[#allocation6 + $0x138] sm:$0xff] }
  0xd1   :  { %599 = vmatprep.subr.bf16.mxu1 %v412_v39 }
  0xd3   :  { %518 = vmatpush1.bf16.msra.mxu0 %v409_v41  ;;  %v431_v41 = vunpack.c.h.s8.bf16 %v331_v23  ;;  %v347_v23 = vld [vmem:[#allocation6 + $0x190] sm:$0xff] }
  0xd4   :  { %519 = vmatprep.subr.bf16.mxu0 %v414_v42  ;;  %600 = vmatpush1.bf16.msra.mxu1 %v411_v43  ;;  %v434_v42 = vunpack.c.l.s8.bf16 %v334_v37  ;;  %v436_v43 = vunpack.c.l.s8.bf16 %v336_v38 }
  0xd5   :  { %601 = vmatprep.subr.bf16.mxu1 %v416_v44  ;;  %v333_v44 = vld [vmem:[#allocation6 + $0x120] sm:$0xff] }
  0xd6   :  { %v437_v52 = vunpack.c.h.s8.bf16 %v333_v44 }
  0xd7   :  { %520 = vmatpush1.bf16.msra.mxu0 %v413_v45  ;;  %v335_v45 = vld [vmem:[#allocation6 + $0x130] sm:$0xff] }
  0xd8   :  { %602 = vmatpush1.bf16.msra.mxu1 %v415_v46  ;;  %521 = vmatprep.subr.bf16.mxu0 %v418_v49  ;;  %v433_v46 = vunpack.c.l.s8.bf16 %v333_v44  ;;  %v435_v47 = vunpack.c.l.s8.bf16 %v335_v45  ;;  %v440_v49 = vunpack.c.h.s8.bf16 %v336_v38 }
  0xd9   :  { %603 = vmatprep.subr.bf16.mxu1 %v420_v50  ;;  %v338_v50 = vld [vmem:[#allocation6 + $0x148] sm:$0xff] }
  0xda   :  { %v446_v60 = vunpack.c.h.s8.bf16 %v338_v50 }
  0xdb   :  { %522 = vmatpush1.bf16.msra.mxu0 %v417_v53  ;;  %v439_v53 = vunpack.c.h.s8.bf16 %v335_v45 }
  0xdc   :  { %604 = vmatpush1.bf16.msra.mxu1 %v419_v54  ;;  %523 = vmatprep.subr.bf16.mxu0 %v422_v55  ;;  %v442_v54 = vunpack.c.l.s8.bf16 %v338_v50  ;;  %v444_v55 = vunpack.c.l.s8.bf16 %v340_v51 }
  0xdd   :  { %605 = vmatprep.subr.bf16.mxu1 %v424_v56  ;;  %v337_v56 = vld [vmem:[#allocation6 + $0x140] sm:$0xff] }
  0xde   :  { %v445_v1 = vunpack.c.h.s8.bf16 %v337_v56 }
  0xdf   :  { %524 = vmatpush1.bf16.msra.mxu0 %v421_v57  ;;  %v339_v57 = vld [vmem:[#allocation6 + $0x150] sm:$0xff] }
  0xe0   :  { %606 = vmatpush1.bf16.msra.mxu1 %v423_v58  ;;  %534 = vmatprep.subr.bf16.mxu0 %v426_v61  ;;  %v441_v58 = vunpack.c.l.s8.bf16 %v337_v56  ;;  %v443_v59 = vunpack.c.l.s8.bf16 %v339_v57  ;;  %v448_v61 = vunpack.c.h.s8.bf16 %v340_v51 }
  0xe1   :  { %616 = vmatprep.subr.bf16.mxu1 %v428_v62  ;;  %v342_v62 = vld [vmem:[#allocation6 + $0x168] sm:$0xff] }
 0x175   :  { %v209_v11 = vpop.f32.mrb[0].mxu0 }
 0x176   :  { %v273_v14 = vmul.f32 %v260_v6, %v209_v11  ;;  %v211_v15 = vpop.f32.mrb[1].mxu0  ;;  %v250_v18 = vpop.f32.mrb[0].mxu1  ;;  %v447_v6 = vunpack.c.h.s8.bf16 %v339_v57  ;;  %v343_v11 = vld [vmem:[#allocation6 + $0x170] sm:$0xff] }
 0x177   :  { %v274_v16 = vmul.f32 %v264_v8, %v211_v15  ;;  %v213_v17 = vpop.f32.mrb[2].mxu0  ;;  %v2550_v24 = vmul.f32 %v268_v10, %v250_v18  ;;  %v252_v25 = vpop.f32.mrb[1].mxu1  ;;  %v450_v8 = vunpack.c.l.s8.bf16 %v342_v62  ;;  %v341_v10 = vld [vmem:[#allocation6 + $0x160] sm:$0xff]  ;;  %v456_v15 = vunpack.c.h.s8.bf16 %v344_v63 }
 0x178   :  { %v293_v20 = vadd.f32 %v280_v9, %v273_v14  ;;  %v214_v21 = vpop.f32.mrb[3].mxu0  ;;  %v276_v27 = vmul.f32 %v272_v13, %v252_v25  ;;  %v254_v28 = vpop.f32.mrb[2].mxu1  ;;  %v452_v9 = vunpack.c.l.s8.bf16 %v344_v63  ;;  %v451_v13 = vunpack.c.l.s8.bf16 %v343_v11  ;;  %v348_v17 = vld [vmem:[#allocation6 + $0x198] sm:$0xff] }
 0x179   :  { %v294_v26 = vadd.f32 %v284_v12, %v274_v16  ;;  %v255_v29 = vpop.f32.mrb[3].mxu1  ;;  %v449_v12 = vunpack.c.l.s8.bf16 %v341_v10  ;;  %v454_v14 = vunpack.c.h.s8.bf16 %v342_v62  ;;  %v346_v16 = vld [vmem:[#allocation6 + $0x188] sm:$0xff]  ;;  %v453_v18 = vunpack.c.h.s8.bf16 %v341_v10 }
 0x17a   :  { %v296_v33 = vadd.f32 %v292_v19, %v276_v27  ;;  %v489_v34 = vpack.c.bf16 %v293_v20, %v293_v20  ;;  %v455_v19 = vunpack.c.h.s8.bf16 %v343_v11  ;;  %v458_v20 = vunpack.c.l.s8.bf16 %v346_v16  ;;  %v350_v29 = vld [vmem:[#allocation6 + $0x1a8] sm:$0xff] }
 0x17b   :  { %v490_v30 = vpack.c.bf16 %v294_v26, %v294_v26  ;;  %v460_v21 = vunpack.c.l.s8.bf16 %v348_v17  ;;  %v457_v25 = vunpack.c.l.s8.bf16 %v345_v22  ;;  %v459_v26 = vunpack.c.l.s8.bf16 %v347_v23 }
 0x17c   :  { %v492_v39 = vpack.c.bf16 %v296_v33, %v296_v33  ;;  %v462_v27 = vunpack.c.h.s8.bf16 %v346_v16  ;;  %v464_v28 = vunpack.c.h.s8.bf16 %v348_v17  ;;  %v466_v33 = vunpack.c.l.s8.bf16 %v350_v29  ;;  %v703_v16 = vld [vmem:[#allocation7 + $0x10] sm:$0xff] }
 0x17d   :  { %525 = vmatprep.mubr.bf16.mxu0 %v490_v30  ;;  %607 = vmatprep.mubr.bf16.mxu1 %v490_v30  ;;  %v352_v30 = vld [vmem:[#allocation6 + $0x1b8] sm:$0xff]  ;;  %v288_v63 = vrot.slane %v2536_v5, %v2532_v3 }
 0x17e   :  { %526 = vmatmul.mubr.bf16.vlgmr.msra.gmra.mrb[4].mxu0 %v489_v34  ;;  %608 = vmatmul.mubr.bf16.vlgmr.msra.gmra.mrb[4].mxu1 %v489_v34  ;;  %v468_v34 = vunpack.c.l.s8.bf16 %v352_v30 }
 0x17f   :  { %535 = vmatpush1.bf16.msra.mxu0 %v425_v31  ;;  %617 = vmatpush1.bf16.msra.mxu1 %v427_v32  ;;  %v461_v31 = vunpack.c.h.s8.bf16 %v345_v22  ;;  %v463_v32 = vunpack.c.h.s8.bf16 %v347_v23  ;;  %v706_v22 = vld [vmem:[#allocation7 + $0x28] sm:$0xff]  ;;  %v708_v23 = vld [vmem:[#allocation7 + $0x38] sm:$0xff] }
 0x180   :  { %536 = vmatprep.subr.bf16.mxu0 %v430_v35  ;;  %618 = vmatprep.subr.bf16.mxu1 %v432_v36  ;;  %v349_v35 = vld [vmem:[#allocation6 + $0x1a0] sm:$0xff]  ;;  %v351_v36 = vld [vmem:[#allocation6 + $0x1b0] sm:$0xff] }
 0x181   :  { %566 = vmatprep.mubr.bf16.mxu0 %v492_v39  ;;  %648 = vmatprep.mubr.bf16.mxu1 %v492_v39  ;;  %v465_v37 = vunpack.c.l.s8.bf16 %v349_v35  ;;  %v467_v38 = vunpack.c.l.s8.bf16 %v351_v36  ;;  %v470_v39 = vunpack.c.h.s8.bf16 %v350_v29  ;;  %v471_v44 = vunpack.c.h.s8.bf16 %v351_v36  ;;  %v707_v29 = vld [vmem:[#allocation7 + $0x30] sm:$0xff] }
 0x183   :  { %537 = vmatpush1.bf16.msra.mxu0 %v429_v40  ;;  %619 = vmatpush1.bf16.msra.mxu1 %v431_v41  ;;  %v472_v40 = vunpack.c.h.s8.bf16 %v352_v30  ;;  %v354_v41 = vld [vmem:[#allocation6 + $0x1c8] sm:$0xff] }
 0x184   :  { %538 = vmatprep.subr.bf16.mxu0 %v434_v42  ;;  %620 = vmatprep.subr.bf16.mxu1 %v436_v43  ;;  %v356_v42 = vld [vmem:[#allocation6 + $0x1d8] sm:$0xff]  ;;  %v469_v43 = vunpack.c.h.s8.bf16 %v349_v35  ;;  %v474_v45 = vunpack.c.l.s8.bf16 %v354_v41  ;;  %v478_v51 = vunpack.c.h.s8.bf16 %v354_v41  ;;  %v711_v41 = vld [vmem:[#allocation7 + $0x50] sm:$0xff] }
 0x185   :  { %v712_v35 = vld [vmem:[#allocation7 + $0x58] sm:$0xff] }
 0x187   :  { %539 = vmatpush1.bf16.msra.mxu0 %v433_v46  ;;  %621 = vmatpush1.bf16.msra.mxu1 %v435_v47  ;;  %v476_v46 = vunpack.c.l.s8.bf16 %v356_v42  ;;  %v353_v47 = vld [vmem:[#allocation6 + $0x1c0] sm:$0xff] }
 0x188   :  { %540 = vmatprep.subr.bf16.mxu0 %v438_v48  ;;  %622 = vmatprep.subr.bf16.mxu1 %v440_v49  ;;  %v355_v48 = vld [vmem:[#allocation6 + $0x1d0] sm:$0xff]  ;;  %v473_v49 = vunpack.c.l.s8.bf16 %v353_v47 }
 0x189   :  { %v475_v50 = vunpack.c.l.s8.bf16 %v355_v48  ;;  %v479_v56 = vunpack.c.h.s8.bf16 %v355_v48 }
 0x18b   :  { %541 = vmatpush1.bf16.msra.mxu0 %v437_v52  ;;  %623 = vmatpush1.bf16.msra.mxu1 %v439_v53  ;;  %v480_v52 = vunpack.c.h.s8.bf16 %v356_v42  ;;  %v358_v53 = vld [vmem:[#allocation6 + $0x1e8] sm:$0xff] }
 0x18c   :  { %542 = vmatprep.subr.bf16.mxu0 %v442_v54  ;;  %624 = vmatprep.subr.bf16.mxu1 %v444_v55  ;;  %v360_v54 = vld [vmem:[#allocation6 + $0x1f8] sm:$0xff]  ;;  %v477_v55 = vunpack.c.h.s8.bf16 %v353_v47  ;;  %v482_v57 = vunpack.c.l.s8.bf16 %v358_v53 }
 0x18d   :  { %v716_v47 = vld [vmem:[#allocation7 + $0x78] sm:$0xff] }
 0x18f   :  { %543 = vmatpush1.bf16.msra.mxu0 %v441_v58  ;;  %625 = vmatpush1.bf16.msra.mxu1 %v443_v59  ;;  %v484_v58 = vunpack.c.l.s8.bf16 %v360_v54  ;;  %v357_v59 = vld [vmem:[#allocation6 + $0x1e0] sm:$0xff] }
 0x190   :  { %544 = vmatprep.subr.bf16.mxu0 %v446_v60  ;;  %626 = vmatprep.subr.bf16.mxu1 %v448_v61  ;;  %v359_v60 = vld [vmem:[#allocation6 + $0x1f0] sm:$0xff]  ;;  %v481_v61 = vunpack.c.l.s8.bf16 %v357_v59  ;;  %v485_v10 = vunpack.c.h.s8.bf16 %v357_v59  ;;  %v720_v59 = vld [vmem:[#allocation7 + $0x98] sm:$0xff] }
 0x191   :  { %v483_v62 = vunpack.c.l.s8.bf16 %v359_v60  ;;  %v487_v11 = vunpack.c.h.s8.bf16 %v359_v60 }
 0x193   :  { %545 = vmatpush1.bf16.msra.mxu0 %v445_v1  ;;  %627 = vmatpush1.bf16.msra.mxu1 %v447_v6  ;;  %v486_v1 = vunpack.c.h.s8.bf16 %v358_v53  ;;  %v488_v6 = vunpack.c.h.s8.bf16 %v360_v54  ;;  %v715_v53 = vld [vmem:[#allocation7 + $0x70] sm:$0xff] }
 0x194   :  { %546 = vmatprep.subr.bf16.mxu0 %v450_v8  ;;  %628 = vmatprep.subr.bf16.mxu1 %v452_v9  ;;  %v702_v8 = vld [vmem:[#allocation7 + $0x8] sm:$0xff]  ;;  %v704_v9 = vld [vmem:[#allocation7 + $0x18] sm:$0xff] }
 0x197   :  { %547 = vmatpush1.bf16.msra.mxu0 %v449_v12  ;;  %629 = vmatpush1.bf16.msra.mxu1 %v451_v13  ;;  %v295_v12 = vadd.f32 %v288_v63, %v2550_v24  ;;  %v766_v13 = vunpack.c.l.s8.bf16 %v702_v8  ;;  %v800_v63 = vunpack.c.l.s8.bf16 %v720_v59 }
 0x198   :  { %548 = vmatprep.subr.bf16.mxu0 %v454_v14  ;;  %630 = vmatprep.subr.bf16.mxu1 %v456_v15  ;;  %v768_v14 = vunpack.c.l.s8.bf16 %v704_v9  ;;  %v701_v15 = vld [vmem:[#allocation7] sm:$0xff] }
 0x199   :  { %v765_v17 = vunpack.c.l.s8.bf16 %v701_v15  ;;  %v769_v24 = vunpack.c.h.s8.bf16 %v701_v15 }
 0x19b   :  { %549 = vmatpush1.bf16.msra.mxu0 %v453_v18  ;;  %631 = vmatpush1.bf16.msra.mxu1 %v455_v19  ;;  %v767_v18 = vunpack.c.l.s8.bf16 %v703_v16  ;;  %v491_v19 = vpack.c.bf16 %v295_v12, %v295_v12  ;;  %v722_v12 = vld [vmem:[#allocation7 + $0xa8] sm:$0xff] }
 0x19c   :  { %550 = vmatprep.subr.bf16.mxu0 %v458_v20  ;;  %632 = vmatprep.subr.bf16.mxu1 %v460_v21  ;;  %v770_v20 = vunpack.c.h.s8.bf16 %v702_v8  ;;  %v772_v21 = vunpack.c.h.s8.bf16 %v704_v9 }
 0x19f   :  { %551 = vmatpush1.bf16.msra.mxu0 %v457_v25  ;;  %633 = vmatpush1.bf16.msra.mxu1 %v459_v26  ;;  %v771_v25 = vunpack.c.h.s8.bf16 %v703_v16  ;;  %v774_v26 = vunpack.c.l.s8.bf16 %v706_v22  ;;  %v806_v16 = vunpack.c.l.s8.bf16 %v722_v12 }
 0x1a0   :  { %552 = vmatprep.subr.bf16.mxu0 %v462_v27  ;;  %634 = vmatprep.subr.bf16.mxu1 %v464_v28  ;;  %v776_v27 = vunpack.c.l.s8.bf16 %v708_v23  ;;  %v705_v28 = vld [vmem:[#allocation7 + $0x20] sm:$0xff] }
 0x1a1   :  { %v773_v30 = vunpack.c.l.s8.bf16 %v705_v28  ;;  %v777_v36 = vunpack.c.h.s8.bf16 %v705_v28 }
 0x1a3   :  { %553 = vmatpush1.bf16.msra.mxu0 %v461_v31  ;;  %635 = vmatpush1.bf16.msra.mxu1 %v463_v32  ;;  %v775_v31 = vunpack.c.l.s8.bf16 %v707_v29  ;;  %v778_v32 = vunpack.c.h.s8.bf16 %v706_v22  ;;  %v810_v22 = vunpack.c.h.s8.bf16 %v722_v12 }
 0x1a4   :  { %554 = vmatprep.subr.bf16.mxu0 %v466_v33  ;;  %636 = vmatprep.subr.bf16.mxu1 %v468_v34  ;;  %v780_v33 = vunpack.c.h.s8.bf16 %v708_v23  ;;  %v710_v34 = vld [vmem:[#allocation7 + $0x48] sm:$0xff] }
 0x1a7   :  { %555 = vmatpush1.bf16.msra.mxu0 %v465_v37  ;;  %637 = vmatpush1.bf16.msra.mxu1 %v467_v38  ;;  %v779_v37 = vunpack.c.h.s8.bf16 %v707_v29  ;;  %v782_v38 = vunpack.c.l.s8.bf16 %v710_v34 }
 0x1a8   :  { %556 = vmatprep.subr.bf16.mxu0 %v470_v39  ;;  %638 = vmatprep.subr.bf16.mxu1 %v472_v40  ;;  %v784_v39 = vunpack.c.l.s8.bf16 %v712_v35  ;;  %v709_v40 = vld [vmem:[#allocation7 + $0x40] sm:$0xff] }
 0x1a9   :  { %v781_v42 = vunpack.c.l.s8.bf16 %v709_v40  ;;  %v785_v48 = vunpack.c.h.s8.bf16 %v709_v40 }
 0x1ab   :  { %557 = vmatpush1.bf16.msra.mxu0 %v469_v43  ;;  %639 = vmatpush1.bf16.msra.mxu1 %v471_v44  ;;  %v783_v43 = vunpack.c.l.s8.bf16 %v711_v41  ;;  %v786_v44 = vunpack.c.h.s8.bf16 %v710_v34 }
 0x1ac   :  { %558 = vmatprep.subr.bf16.mxu0 %v474_v45  ;;  %640 = vmatprep.subr.bf16.mxu1 %v476_v46  ;;  %v788_v45 = vunpack.c.h.s8.bf16 %v712_v35  ;;  %v714_v46 = vld [vmem:[#allocation7 + $0x68] sm:$0xff] }
 0x1af   :  { %559 = vmatpush1.bf16.msra.mxu0 %v473_v49  ;;  %641 = vmatpush1.bf16.msra.mxu1 %v475_v50  ;;  %v787_v49 = vunpack.c.h.s8.bf16 %v711_v41  ;;  %v790_v50 = vunpack.c.l.s8.bf16 %v714_v46 }
 0x1b0   :  { %560 = vmatprep.subr.bf16.mxu0 %v478_v51  ;;  %642 = vmatprep.subr.bf16.mxu1 %v480_v52  ;;  %v792_v51 = vunpack.c.l.s8.bf16 %v716_v47  ;;  %v713_v52 = vld [vmem:[#allocation7 + $0x60] sm:$0xff] }
 0x1b1   :  { %v789_v54 = vunpack.c.l.s8.bf16 %v713_v52  ;;  %v793_v60 = vunpack.c.h.s8.bf16 %v713_v52 }
 0x1b3   :  { %561 = vmatpush1.bf16.msra.mxu0 %v477_v55  ;;  %643 = vmatpush1.bf16.msra.mxu1 %v479_v56  ;;  %v791_v55 = vunpack.c.l.s8.bf16 %v715_v53  ;;  %v794_v56 = vunpack.c.h.s8.bf16 %v714_v46 }
 0x1b4   :  { %562 = vmatprep.subr.bf16.mxu0 %v482_v57  ;;  %644 = vmatprep.subr.bf16.mxu1 %v484_v58  ;;  %v796_v57 = vunpack.c.h.s8.bf16 %v716_v47  ;;  %v718_v58 = vld [vmem:[#allocation7 + $0x88] sm:$0xff] }
 0x1b7   :  { %563 = vmatpush1.bf16.msra.mxu0 %v481_v61  ;;  %645 = vmatpush1.bf16.msra.mxu1 %v483_v62  ;;  %v795_v61 = vunpack.c.h.s8.bf16 %v715_v53  ;;  %v798_v62 = vunpack.c.l.s8.bf16 %v718_v58 }
 0x1b8   :  { %564 = vmatprep.subr.bf16.mxu0 %v486_v1  ;;  %646 = vmatprep.subr.bf16.mxu1 %v488_v6  ;;  %v717_v1 = vld [vmem:[#allocation7 + $0x80] sm:$0xff]  ;;  %v719_v6 = vld [vmem:[#allocation7 + $0x90] sm:$0xff] }
 0x1b9   :  { %v797_v8 = vunpack.c.l.s8.bf16 %v717_v1  ;;  %v799_v9 = vunpack.c.l.s8.bf16 %v719_v6  ;;  %v803_v15 = vunpack.c.h.s8.bf16 %v719_v6 }
 0x1bb   :  { %565 = vmatpush1.bf16.msra.mxu0 %v485_v10  ;;  %647 = vmatpush1.bf16.msra.mxu1 %v487_v11  ;;  %v802_v10 = vunpack.c.h.s8.bf16 %v718_v58  ;;  %v804_v11 = vunpack.c.h.s8.bf16 %v720_v59 }
 0x1bc   :  { %897 = vmatprep.subr.bf16.mxu0 %v766_v13  ;;  %979 = vmatprep.subr.bf16.mxu1 %v768_v14  ;;  %v724_v13 = vld [vmem:[#allocation7 + $0xb8] sm:$0xff]  ;;  %v801_v14 = vunpack.c.h.s8.bf16 %v717_v1 }
 0x1bd   :  { %v812_v23 = vunpack.c.h.s8.bf16 %v724_v13 }
 0x1be   :  { %567 = vmatmul.mubr.bf16.vlgmr.msra.gmra.mrb[4].mxu0 %v491_v19  ;;  %649 = vmatmul.mubr.bf16.vlgmr.msra.gmra.mrb[4].mxu1 %v491_v19  ;;  %v723_v19 = vld [vmem:[#allocation7 + $0xb0] sm:$0xff] }
 0x1bf   :  { %898 = vmatpush1.bf16.msra.mxu0 %v765_v17  ;;  %980 = vmatpush1.bf16.msra.mxu1 %v767_v18  ;;  %v808_v17 = vunpack.c.l.s8.bf16 %v724_v13  ;;  %v721_v18 = vld [vmem:[#allocation7 + $0xa0] sm:$0xff] }
 0x1c0   :  { %899 = vmatprep.subr.bf16.mxu0 %v770_v20  ;;  %981 = vmatprep.subr.bf16.mxu1 %v772_v21  ;;  %v805_v20 = vunpack.c.l.s8.bf16 %v721_v18  ;;  %v807_v21 = vunpack.c.l.s8.bf16 %v723_v19 }
 0x1c3   :  { %900 = vmatpush1.bf16.msra.mxu0 %v769_v24  ;;  %982 = vmatpush1.bf16.msra.mxu1 %v771_v25  ;;  %v726_v24 = vld [vmem:[#allocation7 + $0xc8] sm:$0xff]  ;;  %v728_v25 = vld [vmem:[#allocation7 + $0xd8] sm:$0xff] }
 0x1c4   :  { %901 = vmatprep.subr.bf16.mxu0 %v774_v26  ;;  %983 = vmatprep.subr.bf16.mxu1 %v776_v27  ;;  %v809_v26 = vunpack.c.h.s8.bf16 %v721_v18  ;;  %v811_v27 = vunpack.c.h.s8.bf16 %v723_v19  ;;  %v814_v28 = vunpack.c.l.s8.bf16 %v726_v24  ;;  %v816_v29 = vunpack.c.l.s8.bf16 %v728_v25  ;;  %v733_v19 = vld [vmem:[#allocation7 + $0x100] sm:$0xff] }
 0x1c5   :  { %v818_v34 = vunpack.c.h.s8.bf16 %v726_v24  ;;  %v820_v35 = vunpack.c.h.s8.bf16 %v728_v25 }
 0x1c7   :  { %902 = vmatpush1.bf16.msra.mxu0 %v773_v30  ;;  %984 = vmatpush1.bf16.msra.mxu1 %v775_v31  ;;  %v725_v30 = vld [vmem:[#allocation7 + $0xc0] sm:$0xff]  ;;  %v727_v31 = vld [vmem:[#allocation7 + $0xd0] sm:$0xff] }
 0x1c8   :  { %903 = vmatprep.subr.bf16.mxu0 %v778_v32  ;;  %985 = vmatprep.subr.bf16.mxu1 %v780_v33  ;;  %v813_v32 = vunpack.c.l.s8.bf16 %v725_v30  ;;  %v815_v33 = vunpack.c.l.s8.bf16 %v727_v31 }
 0x1cb   :  { %904 = vmatpush1.bf16.msra.mxu0 %v777_v36  ;;  %986 = vmatpush1.bf16.msra.mxu1 %v779_v37  ;;  %v817_v36 = vunpack.c.h.s8.bf16 %v725_v30  ;;  %v819_v37 = vunpack.c.h.s8.bf16 %v727_v31  ;;  %v833_v30 = vunpack.c.h.s8.bf16 %v733_v19 }
 0x1cc   :  { %905 = vmatprep.subr.bf16.mxu0 %v782_v38  ;;  %987 = vmatprep.subr.bf16.mxu1 %v784_v39  ;;  %v730_v38 = vld [vmem:[#allocation7 + $0xe8] sm:$0xff]  ;;  %v732_v39 = vld [vmem:[#allocation7 + $0xf8] sm:$0xff] }
 0x1cd   :  { %v822_v40 = vunpack.c.l.s8.bf16 %v730_v38  ;;  %v824_v41 = vunpack.c.l.s8.bf16 %v732_v39  ;;  %v826_v46 = vunpack.c.h.s8.bf16 %v730_v38  ;;  %v828_v47 = vunpack.c.h.s8.bf16 %v732_v39 }
 0x1cf   :  { %906 = vmatpush1.bf16.msra.mxu0 %v781_v42  ;;  %988 = vmatpush1.bf16.msra.mxu1 %v783_v43  ;;  %v729_v42 = vld [vmem:[#allocation7 + $0xe0] sm:$0xff]  ;;  %v731_v43 = vld [vmem:[#allocation7 + $0xf0] sm:$0xff] }
 0x1d0   :  { %907 = vmatprep.subr.bf16.mxu0 %v786_v44  ;;  %989 = vmatprep.subr.bf16.mxu1 %v788_v45  ;;  %v821_v44 = vunpack.c.l.s8.bf16 %v729_v42  ;;  %v823_v45 = vunpack.c.l.s8.bf16 %v731_v43 }
 0x1d3   :  { %908 = vmatpush1.bf16.msra.mxu0 %v785_v48  ;;  %990 = vmatpush1.bf16.msra.mxu1 %v787_v49  ;;  %v825_v48 = vunpack.c.h.s8.bf16 %v729_v42  ;;  %v827_v49 = vunpack.c.h.s8.bf16 %v731_v43 }
 0x1d4   :  { %909 = vmatprep.subr.bf16.mxu0 %v790_v50  ;;  %991 = vmatprep.subr.bf16.mxu1 %v792_v51  ;;  %v734_v50 = vld [vmem:[#allocation7 + $0x108] sm:$0xff]  ;;  %v736_v51 = vld [vmem:[#allocation7 + $0x118] sm:$0xff] }
 0x1d5   :  { %v830_v52 = vunpack.c.l.s8.bf16 %v734_v50  ;;  %v832_v53 = vunpack.c.l.s8.bf16 %v736_v51  ;;  %v834_v25 = vunpack.c.h.s8.bf16 %v734_v50 }
 0x1d7   :  { %910 = vmatpush1.bf16.msra.mxu0 %v789_v54  ;;  %992 = vmatpush1.bf16.msra.mxu1 %v791_v55  ;;  %v659_v54 = vsub.s32 7, %v2526_v0  ;;  %v2557_v55 = vsub.s32 1, %v2526_v0 }
 0x1d8   :  { %911 = vmatprep.subr.bf16.mxu0 %v794_v56  ;;  %993 = vmatprep.subr.bf16.mxu1 %v796_v57 }
 0x1d9   :  { %v660_v56 = vrot.slane %v2529_v2, %v659_v54  ;;  %v668_v57 = vrot.slane %v2536_v5, %v659_v54  ;;  %v664_v58 = vrot.slane %v2534_v4, %v659_v54  ;;  %v672_v59 = vrot.slane %v2539_v7, %v659_v54 }
 0x1da   :  { %v692_v1 = vrot.slane %v2539_v7, %v2557_v55 }
 0x1db   :  { %912 = vmatpush1.bf16.msra.mxu0 %v793_v60  ;;  %994 = vmatpush1.bf16.msra.mxu1 %v795_v61  ;;  %v680_v60 = vrot.slane %v2529_v2, %v2557_v55 }
 0x1dc   :  { %913 = vmatprep.subr.bf16.mxu0 %v798_v62  ;;  %995 = vmatprep.subr.bf16.mxu1 %v800_v63  ;;  %v684_v63 = vrot.slane %v2534_v4, %v2557_v55  ;;  %v735_v4 = vld [vmem:[#allocation7 + $0x110] sm:$0xff] }
 0x1dd   :  { %v835_v31 = vunpack.c.h.s8.bf16 %v735_v4 }
 0x1df   :  { %914 = vmatpush1.bf16.msra.mxu0 %v797_v8  ;;  %996 = vmatpush1.bf16.msra.mxu1 %v799_v9 }
 0x1e0   :  { %915 = vmatprep.subr.bf16.mxu0 %v802_v10  ;;  %997 = vmatprep.subr.bf16.mxu1 %v804_v11 }
 0x1e3   :  { %916 = vmatpush1.bf16.msra.mxu0 %v801_v14  ;;  %998 = vmatpush1.bf16.msra.mxu1 %v803_v15 }
 0x1e4   :  { %917 = vmatprep.subr.bf16.mxu0 %v806_v16  ;;  %999 = vmatprep.subr.bf16.mxu1 %v808_v17 }
 0x1e7   :  { %918 = vmatpush1.bf16.msra.mxu0 %v805_v20  ;;  %1000 = vmatpush1.bf16.msra.mxu1 %v807_v21 }
 0x1e8   :  { %919 = vmatprep.subr.bf16.mxu0 %v810_v22  ;;  %1001 = vmatprep.subr.bf16.mxu1 %v812_v23  ;;  %v829_v22 = vunpack.c.l.s8.bf16 %v733_v19  ;;  %v831_v23 = vunpack.c.l.s8.bf16 %v735_v4  ;;  %v756_v19 = vld [vmem:[#allocation7 + $0x1b8] sm:$0xff] }
 0x1eb   :  { %920 = vmatpush1.bf16.msra.mxu0 %v809_v26  ;;  %1002 = vmatpush1.bf16.msra.mxu1 %v811_v27  ;;  %v836_v26 = vunpack.c.h.s8.bf16 %v736_v51  ;;  %v738_v27 = vld [vmem:[#allocation7 + $0x128] sm:$0xff] }
 0x1ec   :  { %921 = vmatprep.subr.bf16.mxu0 %v814_v28  ;;  %1003 = vmatprep.subr.bf16.mxu1 %v816_v29  ;;  %v740_v28 = vld [vmem:[#allocation7 + $0x138] sm:$0xff]  ;;  %v842_v38 = vunpack.c.h.s8.bf16 %v738_v27 }
 0x1ed   :  { %v844_v39 = vunpack.c.h.s8.bf16 %v740_v28 }
 0x1ef   :  { %922 = vmatpush1.bf16.msra.mxu0 %v813_v32  ;;  %1004 = vmatpush1.bf16.msra.mxu1 %v815_v33  ;;  %v838_v32 = vunpack.c.l.s8.bf16 %v738_v27  ;;  %v840_v33 = vunpack.c.l.s8.bf16 %v740_v28  ;;  %v876_v27 = vunpack.c.h.s8.bf16 %v756_v19  ;;  %v758_v28 = vld [vmem:[#allocation7 + $0x1c8] sm:$0xff] }
 0x1f0   :  { %923 = vmatprep.subr.bf16.mxu0 %v818_v34  ;;  %1005 = vmatprep.subr.bf16.mxu1 %v820_v35  ;;  %v737_v34 = vld [vmem:[#allocation7 + $0x120] sm:$0xff]  ;;  %v739_v35 = vld [vmem:[#allocation7 + $0x130] sm:$0xff] }
 0x1f1   :  { %v841_v42 = vunpack.c.h.s8.bf16 %v737_v34  ;;  %v843_v43 = vunpack.c.h.s8.bf16 %v739_v35 }
 0x1f3   :  { %924 = vmatpush1.bf16.msra.mxu0 %v817_v36  ;;  %1006 = vmatpush1.bf16.msra.mxu1 %v819_v37  ;;  %v837_v36 = vunpack.c.l.s8.bf16 %v737_v34  ;;  %v839_v37 = vunpack.c.l.s8.bf16 %v739_v35  ;;  %v757_v34 = vld [vmem:[#allocation7 + $0x1c0] sm:$0xff]  ;;  %v759_v35 = vld [vmem:[#allocation7 + $0x1d0] sm:$0xff] }
 0x1f4   :  { %925 = vmatprep.subr.bf16.mxu0 %v822_v40  ;;  %1007 = vmatprep.subr.bf16.mxu1 %v824_v41  ;;  %v742_v40 = vld [vmem:[#allocation7 + $0x148] sm:$0xff]  ;;  %v744_v41 = vld [vmem:[#allocation7 + $0x158] sm:$0xff] }
 0x1f5   :  { %v850_v50 = vunpack.c.h.s8.bf16 %v742_v40  ;;  %v852_v51 = vunpack.c.h.s8.bf16 %v744_v41 }
 0x1f7   :  { %926 = vmatpush1.bf16.msra.mxu0 %v821_v44  ;;  %1008 = vmatpush1.bf16.msra.mxu1 %v823_v45  ;;  %v846_v44 = vunpack.c.l.s8.bf16 %v742_v40  ;;  %v848_v45 = vunpack.c.l.s8.bf16 %v744_v41  ;;  %v762_v40 = vld [vmem:[#allocation7 + $0x1e8] sm:$0xff]  ;;  %v764_v41 = vld [vmem:[#allocation7 + $0x1f8] sm:$0xff] }
 0x1f8   :  { %927 = vmatprep.subr.bf16.mxu0 %v826_v46  ;;  %1009 = vmatprep.subr.bf16.mxu1 %v828_v47  ;;  %v741_v46 = vld [vmem:[#allocation7 + $0x140] sm:$0xff]  ;;  %v743_v47 = vld [vmem:[#allocation7 + $0x150] sm:$0xff] }
 0x1f9   :  { %v849_v54 = vunpack.c.h.s8.bf16 %v741_v46 }
 0x1fb   :  { %928 = vmatpush1.bf16.msra.mxu0 %v825_v48  ;;  %1010 = vmatpush1.bf16.msra.mxu1 %v827_v49  ;;  %v845_v48 = vunpack.c.l.s8.bf16 %v741_v46  ;;  %v847_v49 = vunpack.c.l.s8.bf16 %v743_v47  ;;  %v886_v46 = vunpack.c.l.s8.bf16 %v762_v40 }
 0x1fc   :  { %938 = vmatprep.subr.bf16.mxu0 %v830_v52  ;;  %1020 = vmatprep.subr.bf16.mxu1 %v832_v53  ;;  %v746_v52 = vld [vmem:[#allocation7 + $0x168] sm:$0xff]  ;;  %v748_v53 = vld [vmem:[#allocation7 + $0x178] sm:$0xff] }
 0x291   :  { %v568_v61 = vpop.f32.mrb[4].mxu0  ;;  %v650_v62 = vpop.f32.mrb[4].mxu1 }
 0x292   :  { %v673_v6 = vmul.f32 %v660_v56, %v568_v61  ;;  %v2569_v8 = vmul.f32 %v668_v57, %v650_v62  ;;  %v570_v9 = vpop.f32.mrb[5].mxu0  ;;  %v652_v5 = vpop.f32.mrb[5].mxu1  ;;  %v851_v56 = vunpack.c.h.s8.bf16 %v743_v47  ;;  %v854_v57 = vunpack.c.l.s8.bf16 %v746_v52 }
 0x293   :  { %v674_v10 = vmul.f32 %v664_v58, %v570_v9  ;;  %v676_v11 = vmul.f32 %v672_v59, %v652_v5  ;;  %v572_v12 = vpop.f32.mrb[6].mxu0  ;;  %v654_v13 = vpop.f32.mrb[6].mxu1  ;;  %v856_v58 = vunpack.c.l.s8.bf16 %v748_v53  ;;  %v745_v59 = vld [vmem:[#allocation7 + $0x160] sm:$0xff]  ;;  %v752_v9 = vld [vmem:[#allocation7 + $0x198] sm:$0xff]  ;;  %v888_v47 = vunpack.c.l.s8.bf16 %v764_v41 }
 0x294   :  { %v693_v14 = vadd.f32 %v680_v60, %v673_v6  ;;  %v573_v15 = vpop.f32.mrb[7].mxu0  ;;  %v655_v2 = vpop.f32.mrb[7].mxu1  ;;  %v747_v60 = vld [vmem:[#allocation7 + $0x170] sm:$0xff]  ;;  %v853_v61 = vunpack.c.l.s8.bf16 %v745_v59  ;;  %v750_v6 = vld [vmem:[#allocation7 + $0x188] sm:$0xff]  ;;  %v857_v5 = vunpack.c.h.s8.bf16 %v745_v59  ;;  %v864_v12 = vunpack.c.l.s8.bf16 %v752_v9  ;;  %v749_v13 = vld [vmem:[#allocation7 + $0x180] sm:$0xff] }
 0x295   :  { %v694_v16 = vadd.f32 %v684_v63, %v674_v10  ;;  %v696_v17 = vadd.f32 %v692_v1, %v676_v11  ;;  %v855_v62 = vunpack.c.l.s8.bf16 %v747_v60  ;;  %v858_v63 = vunpack.c.h.s8.bf16 %v746_v52 }
 0x296   :  { %v697_v18 = vmax.f32 %v693_v14, 0.0  ;;  %v860_v1 = vunpack.c.h.s8.bf16 %v748_v53  ;;  %v859_v10 = vunpack.c.h.s8.bf16 %v747_v60  ;;  %v862_v11 = vunpack.c.l.s8.bf16 %v750_v6  ;;  %v751_v14 = vld [vmem:[#allocation7 + $0x190] sm:$0xff] }
 0x297   :  { %v698_v20 = vmax.f32 %v694_v16, 0.0  ;;  %v700_v21 = vmax.f32 %v696_v17, 0.0  ;;  %v861_v15 = vunpack.c.l.s8.bf16 %v749_v13  ;;  %v863_v2 = vunpack.c.l.s8.bf16 %v751_v14 }
 0x298   :  { %v893_v24 = vpack.c.bf16 %v697_v18, %v697_v18  ;;  %v866_v16 = vunpack.c.h.s8.bf16 %v750_v6  ;;  %v868_v17 = vunpack.c.h.s8.bf16 %v752_v9  ;;  %v754_v18 = vld [vmem:[#allocation7 + $0x1a8] sm:$0xff]  ;;  %v865_v4 = vunpack.c.h.s8.bf16 %v749_v13 }
 0x299   :  { %v894_v7 = vpack.c.bf16 %v698_v20, %v698_v20  ;;  %v896_v29 = vpack.c.bf16 %v700_v21, %v700_v21  ;;  %v867_v20 = vunpack.c.h.s8.bf16 %v751_v14  ;;  %v870_v21 = vunpack.c.l.s8.bf16 %v754_v18 }
 0x29a   :  { %v890_v53 = vunpack.c.h.s8.bf16 %v762_v40 }
 0x29b   :  { %929 = vmatprep.mubr.bf16.mxu0 %v894_v7  ;;  %1011 = vmatprep.mubr.bf16.mxu1 %v894_v7  ;;  %v872_v7 = vunpack.c.l.s8.bf16 %v756_v19 }
 0x29c   :  { %930 = vmatmul.mubr.bf16.vlgmr.msra.gmra.mrb[8].mxu0 %v893_v24  ;;  %1012 = vmatmul.mubr.bf16.vlgmr.msra.gmra.mrb[8].mxu1 %v893_v24 }
 0x29d   :  { %939 = vmatpush1.bf16.msra.mxu0 %v829_v22  ;;  %1021 = vmatpush1.bf16.msra.mxu1 %v831_v23  ;;  %v753_v22 = vld [vmem:[#allocation7 + $0x1a0] sm:$0xff]  ;;  %v755_v23 = vld [vmem:[#allocation7 + $0x1b0] sm:$0xff] }
 0x29e   :  { %970 = vmatprep.mubr.bf16.mxu0 %v896_v29  ;;  %1052 = vmatprep.mubr.bf16.mxu1 %v896_v29  ;;  %v869_v24 = vunpack.c.l.s8.bf16 %v753_v22  ;;  %v760_v29 = vld [vmem:[#allocation7 + $0x1d8] sm:$0xff] }
 0x29f   :  { %940 = vmatprep.subr.bf16.mxu0 %v834_v25  ;;  %1022 = vmatprep.subr.bf16.mxu1 %v836_v26  ;;  %v871_v25 = vunpack.c.l.s8.bf16 %v755_v23  ;;  %v874_v26 = vunpack.c.h.s8.bf16 %v754_v18 }
 0x2a1   :  { %941 = vmatpush1.bf16.msra.mxu0 %v833_v30  ;;  %1023 = vmatpush1.bf16.msra.mxu1 %v835_v31  ;;  %v873_v30 = vunpack.c.h.s8.bf16 %v753_v22  ;;  %v875_v31 = vunpack.c.h.s8.bf16 %v755_v23 }
 0x2a2   :  { %942 = vmatprep.subr.bf16.mxu0 %v838_v32  ;;  %1024 = vmatprep.subr.bf16.mxu1 %v840_v33  ;;  %v878_v32 = vunpack.c.l.s8.bf16 %v758_v28  ;;  %v880_v33 = vunpack.c.l.s8.bf16 %v760_v29 }
 0x2a5   :  { %943 = vmatpush1.bf16.msra.mxu0 %v837_v36  ;;  %1025 = vmatpush1.bf16.msra.mxu1 %v839_v37  ;;  %v877_v36 = vunpack.c.l.s8.bf16 %v757_v34  ;;  %v879_v37 = vunpack.c.l.s8.bf16 %v759_v35 }
 0x2a6   :  { %944 = vmatprep.subr.bf16.mxu0 %v842_v38  ;;  %1026 = vmatprep.subr.bf16.mxu1 %v844_v39  ;;  %v882_v38 = vunpack.c.h.s8.bf16 %v758_v28  ;;  %v884_v39 = vunpack.c.h.s8.bf16 %v760_v29 }
 0x2a9   :  { %945 = vmatpush1.bf16.msra.mxu0 %v841_v42  ;;  %1027 = vmatpush1.bf16.msra.mxu1 %v843_v43  ;;  %v881_v42 = vunpack.c.h.s8.bf16 %v757_v34  ;;  %v883_v43 = vunpack.c.h.s8.bf16 %v759_v35 }
 0x2aa   :  { %946 = vmatprep.subr.bf16.mxu0 %v846_v44  ;;  %1028 = vmatprep.subr.bf16.mxu1 %v848_v45  ;;  %v2571_v44 = vld [vmem:[#allocation13 + $0x10] sm:$0xff] }
 0x2ab   :  { %v688_v45 = vrot.slane %v2571_v44, %v2557_v55 }
 0x2ad   :  { %947 = vmatpush1.bf16.msra.mxu0 %v845_v48  ;;  %1029 = vmatpush1.bf16.msra.mxu1 %v847_v49  ;;  %v761_v48 = vld [vmem:[#allocation7 + $0x1e0] sm:$0xff]  ;;  %v763_v49 = vld [vmem:[#allocation7 + $0x1f0] sm:$0xff]  ;;  %v695_v52 = vadd.f32 %v688_v45, %v2569_v8  ;;  %v1122_v45 = vld [vmem:[#allocation9 + $0x88] sm:$0xff] }
 0x2ae   :  { %948 = vmatprep.subr.bf16.mxu0 %v850_v50  ;;  %1030 = vmatprep.subr.bf16.mxu1 %v852_v51  ;;  %v885_v50 = vunpack.c.l.s8.bf16 %v761_v48  ;;  %v887_v51 = vunpack.c.l.s8.bf16 %v763_v49  ;;  %v891_v59 = vunpack.c.h.s8.bf16 %v763_v49  ;;  %v1202_v49 = vunpack.c.l.s8.bf16 %v1122_v45 }
 0x2af   :  { %v699_v60 = vmax.f32 %v695_v52, 0.0  ;;  %v1123_v52 = vld [vmem:[#allocation9 + $0x90] sm:$0xff] }
 0x2b1   :  { %949 = vmatpush1.bf16.msra.mxu0 %v849_v54  ;;  %1031 = vmatpush1.bf16.msra.mxu1 %v851_v56  ;;  %v892_v54 = vunpack.c.h.s8.bf16 %v764_v41  ;;  %v1106_v56 = vld [vmem:[#allocation9 + $0x8] sm:$0xff]  ;;  %v895_v9 = vpack.c.bf16 %v699_v60, %v699_v60 }
 0x2b2   :  { %950 = vmatprep.subr.bf16.mxu0 %v854_v57  ;;  %1032 = vmatprep.subr.bf16.mxu1 %v856_v58  ;;  %v1108_v57 = vld [vmem:[#allocation9 + $0x18] sm:$0xff]  ;;  %v889_v58 = vunpack.c.h.s8.bf16 %v761_v48 }
 0x2b5   :  { %951 = vmatpush1.bf16.msra.mxu0 %v853_v61  ;;  %1033 = vmatpush1.bf16.msra.mxu1 %v855_v62  ;;  %v1170_v61 = vunpack.c.l.s8.bf16 %v1106_v56  ;;  %v1172_v62 = vunpack.c.l.s8.bf16 %v1108_v57 }
 0x2b6   :  { %952 = vmatprep.subr.bf16.mxu0 %v858_v63  ;;  %1034 = vmatprep.subr.bf16.mxu1 %v860_v1  ;;  %v1105_v63 = vld [vmem:[#allocation9] sm:$0xff]  ;;  %v1107_v1 = vld [vmem:[#allocation9 + $0x10] sm:$0xff] }
 0x2b7   :  { %v1169_v8 = vunpack.c.l.s8.bf16 %v1105_v63  ;;  %v1171_v6 = vunpack.c.l.s8.bf16 %v1107_v1  ;;  %v1173_v13 = vunpack.c.h.s8.bf16 %v1105_v63  ;;  %v1175_v14 = vunpack.c.h.s8.bf16 %v1107_v1  ;;  %v1125_v1 = vld [vmem:[#allocation9 + $0xa0] sm:$0xff] }
 0x2b9   :  { %953 = vmatpush1.bf16.msra.mxu0 %v857_v5  ;;  %1035 = vmatpush1.bf16.msra.mxu1 %v859_v10  ;;  %v1174_v5 = vunpack.c.h.s8.bf16 %v1106_v56  ;;  %v1176_v10 = vunpack.c.h.s8.bf16 %v1108_v57  ;;  %v1206_v56 = vunpack.c.h.s8.bf16 %v1122_v45 }
 0x2ba   :  { %954 = vmatprep.subr.bf16.mxu0 %v862_v11  ;;  %1036 = vmatprep.subr.bf16.mxu1 %v864_v12  ;;  %v1110_v11 = vld [vmem:[#allocation9 + $0x28] sm:$0xff]  ;;  %v1112_v12 = vld [vmem:[#allocation9 + $0x38] sm:$0xff] }
 0x2bd   :  { %955 = vmatpush1.bf16.msra.mxu0 %v861_v15  ;;  %1037 = vmatpush1.bf16.msra.mxu1 %v863_v2  ;;  %v1178_v15 = vunpack.c.l.s8.bf16 %v1110_v11  ;;  %v1180_v2 = vunpack.c.l.s8.bf16 %v1112_v12 }
 0x2be   :  { %956 = vmatprep.subr.bf16.mxu0 %v866_v16  ;;  %1038 = vmatprep.subr.bf16.mxu1 %v868_v17  ;;  %v1109_v16 = vld [vmem:[#allocation9 + $0x20] sm:$0xff]  ;;  %v1111_v17 = vld [vmem:[#allocation9 + $0x30] sm:$0xff] }
 0x2bf   :  { %v1177_v18 = vunpack.c.l.s8.bf16 %v1109_v16  ;;  %v1179_v19 = vunpack.c.l.s8.bf16 %v1111_v17  ;;  %v1181_v22 = vunpack.c.h.s8.bf16 %v1109_v16  ;;  %v1183_v23 = vunpack.c.h.s8.bf16 %v1111_v17  ;;  %v1129_v16 = vld [vmem:[#allocation9 + $0xc0] sm:$0xff]  ;;  %v1131_v17 = vld [vmem:[#allocation9 + $0xd0] sm:$0xff] }
 0x2c1   :  { %957 = vmatpush1.bf16.msra.mxu0 %v865_v4  ;;  %1039 = vmatpush1.bf16.msra.mxu1 %v867_v20  ;;  %v1182_v4 = vunpack.c.h.s8.bf16 %v1110_v11  ;;  %v1184_v20 = vunpack.c.h.s8.bf16 %v1112_v12  ;;  %v1130_v11 = vld [vmem:[#allocation9 + $0xc8] sm:$0xff]  ;;  %v1132_v12 = vld [vmem:[#allocation9 + $0xd8] sm:$0xff] }
 0x2c2   :  { %958 = vmatprep.subr.bf16.mxu0 %v870_v21  ;;  %1040 = vmatprep.subr.bf16.mxu1 %v872_v7  ;;  %v1114_v21 = vld [vmem:[#allocation9 + $0x48] sm:$0xff]  ;;  %v1116_v7 = vld [vmem:[#allocation9 + $0x58] sm:$0xff] }
 0x2c5   :  { %959 = vmatpush1.bf16.msra.mxu0 %v869_v24  ;;  %1041 = vmatpush1.bf16.msra.mxu1 %v871_v25  ;;  %v1186_v24 = vunpack.c.l.s8.bf16 %v1114_v21  ;;  %v1188_v25 = vunpack.c.l.s8.bf16 %v1116_v7 }
 0x2c6   :  { %960 = vmatprep.subr.bf16.mxu0 %v874_v26  ;;  %1042 = vmatprep.subr.bf16.mxu1 %v876_v27  ;;  %v1113_v26 = vld [vmem:[#allocation9 + $0x40] sm:$0xff]  ;;  %v1115_v27 = vld [vmem:[#allocation9 + $0x50] sm:$0xff] }
 0x2c7   :  { %v1185_v28 = vunpack.c.l.s8.bf16 %v1113_v26  ;;  %v1187_v29 = vunpack.c.l.s8.bf16 %v1115_v27  ;;  %v1189_v34 = vunpack.c.h.s8.bf16 %v1113_v26  ;;  %v1191_v35 = vunpack.c.h.s8.bf16 %v1115_v27  ;;  %v1135_v26 = vld [vmem:[#allocation9 + $0xf0] sm:$0xff] }
 0x2c9   :  { %961 = vmatpush1.bf16.msra.mxu0 %v873_v30  ;;  %1043 = vmatpush1.bf16.msra.mxu1 %v875_v31  ;;  %v1190_v30 = vunpack.c.h.s8.bf16 %v1114_v21  ;;  %v1192_v31 = vunpack.c.h.s8.bf16 %v1116_v7  ;;  %v1221_v21 = vunpack.c.h.s8.bf16 %v1129_v16  ;;  %v1223_v7 = vunpack.c.h.s8.bf16 %v1131_v17 }
 0x2ca   :  { %962 = vmatprep.subr.bf16.mxu0 %v878_v32  ;;  %1044 = vmatprep.subr.bf16.mxu1 %v880_v33  ;;  %v1118_v32 = vld [vmem:[#allocation9 + $0x68] sm:$0xff]  ;;  %v1120_v33 = vld [vmem:[#allocation9 + $0x78] sm:$0xff] }
 0x2cd   :  { %963 = vmatpush1.bf16.msra.mxu0 %v877_v36  ;;  %1045 = vmatpush1.bf16.msra.mxu1 %v879_v37  ;;  %v1194_v36 = vunpack.c.l.s8.bf16 %v1118_v32  ;;  %v1196_v37 = vunpack.c.l.s8.bf16 %v1120_v33 }
 0x2ce   :  { %964 = vmatprep.subr.bf16.mxu0 %v882_v38  ;;  %1046 = vmatprep.subr.bf16.mxu1 %v884_v39  ;;  %v1117_v38 = vld [vmem:[#allocation9 + $0x60] sm:$0xff]  ;;  %v1119_v39 = vld [vmem:[#allocation9 + $0x70] sm:$0xff] }
 0x2cf   :  { %v1193_v40 = vunpack.c.l.s8.bf16 %v1117_v38  ;;  %v1195_v41 = vunpack.c.l.s8.bf16 %v1119_v39  ;;  %v1199_v48 = vunpack.c.h.s8.bf16 %v1119_v39  ;;  %v2579_v39 = vsub.s32 2, %v2526_v0 }
 0x2d1   :  { %965 = vmatpush1.bf16.msra.mxu0 %v881_v42  ;;  %1047 = vmatpush1.bf16.msra.mxu1 %v883_v43  ;;  %v1198_v42 = vunpack.c.h.s8.bf16 %v1118_v32  ;;  %v1200_v43 = vunpack.c.h.s8.bf16 %v1120_v33  ;;  %v1231_v33 = vunpack.c.h.s8.bf16 %v1135_v26 }
 0x2d2   :  { %966 = vmatprep.subr.bf16.mxu0 %v886_v46  ;;  %1048 = vmatprep.subr.bf16.mxu1 %v888_v47  ;;  %v1124_v46 = vld [vmem:[#allocation9 + $0x98] sm:$0xff]  ;;  %v1197_v47 = vunpack.c.h.s8.bf16 %v1117_v38  ;;  %v2576_v38 = vld [vmem:[#allocation13 + $0x20] sm:$0xff] }
 0x2d3   :  { %v1208_v57 = vunpack.c.h.s8.bf16 %v1124_v46 }
 0x2d5   :  { %967 = vmatpush1.bf16.msra.mxu0 %v885_v50  ;;  %1049 = vmatpush1.bf16.msra.mxu1 %v887_v51  ;;  %v1204_v50 = vunpack.c.l.s8.bf16 %v1124_v46  ;;  %v1121_v51 = vld [vmem:[#allocation9 + $0x80] sm:$0xff] }
 0x2d6   :  { %968 = vmatprep.subr.bf16.mxu0 %v890_v53  ;;  %1050 = vmatprep.subr.bf16.mxu1 %v892_v54  ;;  %v1201_v53 = vunpack.c.l.s8.bf16 %v1121_v51  ;;  %v1203_v54 = vunpack.c.l.s8.bf16 %v1123_v52  ;;  %v1205_v60 = vunpack.c.h.s8.bf16 %v1121_v51  ;;  %v2591_v46 = vld [vmem:[#allocation13] sm:$0xff] }
 0x2d9   :  { %969 = vmatpush1.bf16.msra.mxu0 %v889_v58  ;;  %1051 = vmatpush1.bf16.msra.mxu1 %v891_v59  ;;  %v1126_v58 = vld [vmem:[#allocation9 + $0xa8] sm:$0xff]  ;;  %v1128_v59 = vld [vmem:[#allocation9 + $0xb8] sm:$0xff] }
 0x2da   :  { %1301 = vmatprep.subr.bf16.mxu0 %v1170_v61  ;;  %1383 = vmatprep.subr.bf16.mxu1 %v1172_v62  ;;  %v1207_v61 = vunpack.c.h.s8.bf16 %v1123_v52  ;;  %v1210_v62 = vunpack.c.l.s8.bf16 %v1126_v58  ;;  %v1212_v63 = vunpack.c.l.s8.bf16 %v1128_v59  ;;  %v2601_v52 = vld [vmem:[#allocation13 + $0x18] sm:$0xff] }
 0x2dc   :  { %971 = vmatmul.mubr.bf16.vlgmr.msra.gmra.mrb[8].mxu0 %v895_v9  ;;  %1053 = vmatmul.mubr.bf16.vlgmr.msra.gmra.mrb[8].mxu1 %v895_v9 }
 0x2dd   :  { %1302 = vmatpush1.bf16.msra.mxu0 %v1169_v8  ;;  %1384 = vmatpush1.bf16.msra.mxu1 %v1171_v6  ;;  %v1127_v8 = vld [vmem:[#allocation9 + $0xb0] sm:$0xff]  ;;  %v1209_v6 = vunpack.c.l.s8.bf16 %v1125_v1 }
 0x2de   :  { %1303 = vmatprep.subr.bf16.mxu0 %v1174_v5  ;;  %1385 = vmatprep.subr.bf16.mxu1 %v1176_v10  ;;  %v1211_v9 = vunpack.c.l.s8.bf16 %v1127_v8  ;;  %v1214_v5 = vunpack.c.h.s8.bf16 %v1126_v58  ;;  %v1216_v10 = vunpack.c.h.s8.bf16 %v1128_v59 }
 0x2e1   :  { %1304 = vmatpush1.bf16.msra.mxu0 %v1173_v13  ;;  %1386 = vmatpush1.bf16.msra.mxu1 %v1175_v14  ;;  %v1213_v13 = vunpack.c.h.s8.bf16 %v1125_v1  ;;  %v1215_v14 = vunpack.c.h.s8.bf16 %v1127_v8 }
 0x2e2   :  { %1305 = vmatprep.subr.bf16.mxu0 %v1178_v15  ;;  %1387 = vmatprep.subr.bf16.mxu1 %v1180_v2  ;;  %v1218_v15 = vunpack.c.l.s8.bf16 %v1130_v11  ;;  %v1220_v2 = vunpack.c.l.s8.bf16 %v1132_v12 }
 0x2e5   :  { %1306 = vmatpush1.bf16.msra.mxu0 %v1177_v18  ;;  %1388 = vmatpush1.bf16.msra.mxu1 %v1179_v19  ;;  %v1217_v18 = vunpack.c.l.s8.bf16 %v1129_v16  ;;  %v1219_v19 = vunpack.c.l.s8.bf16 %v1131_v17 }
 0x2e6   :  { %1307 = vmatprep.subr.bf16.mxu0 %v1182_v4  ;;  %1389 = vmatprep.subr.bf16.mxu1 %v1184_v20  ;;  %v1222_v4 = vunpack.c.h.s8.bf16 %v1130_v11  ;;  %v1224_v20 = vunpack.c.h.s8.bf16 %v1132_v12 }
 0x2e9   :  { %1308 = vmatpush1.bf16.msra.mxu0 %v1181_v22  ;;  %1390 = vmatpush1.bf16.msra.mxu1 %v1183_v23  ;;  %v1134_v22 = vld [vmem:[#allocation9 + $0xe8] sm:$0xff] }
 0x2ea   :  { %1309 = vmatprep.subr.bf16.mxu0 %v1186_v24  ;;  %1391 = vmatprep.subr.bf16.mxu1 %v1188_v25  ;;  %v1226_v23 = vunpack.c.l.s8.bf16 %v1134_v22  ;;  %v1136_v24 = vld [vmem:[#allocation9 + $0xf8] sm:$0xff]  ;;  %v1133_v25 = vld [vmem:[#allocation9 + $0xe0] sm:$0xff] }
 0x2eb   :  { %v1228_v27 = vunpack.c.l.s8.bf16 %v1136_v24  ;;  %v1229_v32 = vunpack.c.h.s8.bf16 %v1133_v25 }
 0x2ed   :  { %1310 = vmatpush1.bf16.msra.mxu0 %v1185_v28  ;;  %1392 = vmatpush1.bf16.msra.mxu1 %v1187_v29  ;;  %v1225_v28 = vunpack.c.l.s8.bf16 %v1133_v25  ;;  %v1227_v29 = vunpack.c.l.s8.bf16 %v1135_v26 }
 0x2ee   :  { %1311 = vmatprep.subr.bf16.mxu0 %v1190_v30  ;;  %1393 = vmatprep.subr.bf16.mxu1 %v1192_v31  ;;  %v1230_v30 = vunpack.c.h.s8.bf16 %v1134_v22  ;;  %v1232_v31 = vunpack.c.h.s8.bf16 %v1136_v24  ;;  %v1143_v24 = vld [vmem:[#allocation9 + $0x130] sm:$0xff] }
 0x2ef   :  { %v1243_v26 = vunpack.c.l.s8.bf16 %v1143_v24 }
 0x2f1   :  { %1312 = vmatpush1.bf16.msra.mxu0 %v1189_v34  ;;  %1394 = vmatpush1.bf16.msra.mxu1 %v1191_v35  ;;  %v1138_v34 = vld [vmem:[#allocation9 + $0x108] sm:$0xff]  ;;  %v1140_v35 = vld [vmem:[#allocation9 + $0x118] sm:$0xff] }
 0x2f2   :  { %1313 = vmatprep.subr.bf16.mxu0 %v1194_v36  ;;  %1395 = vmatprep.subr.bf16.mxu1 %v1196_v37  ;;  %v1234_v36 = vunpack.c.l.s8.bf16 %v1138_v34  ;;  %v1236_v37 = vunpack.c.l.s8.bf16 %v1140_v35  ;;  %v1238_v16 = vunpack.c.h.s8.bf16 %v1138_v34  ;;  %v1240_v17 = vunpack.c.h.s8.bf16 %v1140_v35  ;;  %v1145_v35 = vld [vmem:[#allocation9 + $0x140] sm:$0xff] }
 0x2f5   :  { %1314 = vmatpush1.bf16.msra.mxu0 %v1193_v40  ;;  %1396 = vmatpush1.bf16.msra.mxu1 %v1195_v41  ;;  %v2581_v40 = vld [vmem:[#allocation13 + $0x28] sm:$0xff]  ;;  %v2583_v41 = vld [vmem:[#allocation13 + $0x38] sm:$0xff] }
 0x2f6   :  { %1315 = vmatprep.subr.bf16.mxu0 %v1198_v42  ;;  %1397 = vmatprep.subr.bf16.mxu1 %v1200_v43  ;;  %v1064_v42 = vrot.slane %v2576_v38, %v2532_v3  ;;  %v1068_v43 = vrot.slane %v2581_v40, %v2532_v3  ;;  %v1076_v45 = vrot.slane %v2583_v41, %v2532_v3 }
 0x2f9   :  { %1316 = vmatpush1.bf16.msra.mxu0 %v1197_v47  ;;  %1398 = vmatpush1.bf16.msra.mxu1 %v1199_v48  ;;  %v1084_v47 = vrot.slane %v2591_v46, %v2579_v39 }
 0x2fa   :  { %1317 = vmatprep.subr.bf16.mxu0 %v1202_v49  ;;  %1399 = vmatprep.subr.bf16.mxu1 %v1204_v50  ;;  %v2597_v50 = vld [vmem:[#allocation13 + $0x8] sm:$0xff] }
 0x2fb   :  { %v1088_v51 = vrot.slane %v2597_v50, %v2579_v39 }
 0x2fd   :  { %1318 = vmatpush1.bf16.msra.mxu0 %v1201_v53  ;;  %1400 = vmatpush1.bf16.msra.mxu1 %v1203_v54  ;;  %v1096_v53 = vrot.slane %v2601_v52, %v2579_v39 }
 0x2fe   :  { %1319 = vmatprep.subr.bf16.mxu0 %v1206_v56  ;;  %1401 = vmatprep.subr.bf16.mxu1 %v1208_v57 }
 0x301   :  { %1320 = vmatpush1.bf16.msra.mxu0 %v1205_v60  ;;  %1402 = vmatpush1.bf16.msra.mxu1 %v1207_v61 }
 0x302   :  { %1321 = vmatprep.subr.bf16.mxu0 %v1210_v62  ;;  %1403 = vmatprep.subr.bf16.mxu1 %v1212_v63 }
 0x305   :  { %1322 = vmatpush1.bf16.msra.mxu0 %v1209_v6  ;;  %1404 = vmatpush1.bf16.msra.mxu1 %v1211_v9 }
 0x306   :  { %1323 = vmatprep.subr.bf16.mxu0 %v1214_v5  ;;  %1405 = vmatprep.subr.bf16.mxu1 %v1216_v10  ;;  %v1137_v5 = vld [vmem:[#allocation9 + $0x100] sm:$0xff]  ;;  %v1139_v10 = vld [vmem:[#allocation9 + $0x110] sm:$0xff] }
 0x309   :  { %1324 = vmatpush1.bf16.msra.mxu0 %v1213_v13  ;;  %1406 = vmatpush1.bf16.msra.mxu1 %v1215_v14  ;;  %v1233_v14 = vunpack.c.l.s8.bf16 %v1137_v5 }
 0x30a   :  { %1325 = vmatprep.subr.bf16.mxu0 %v1218_v15  ;;  %1407 = vmatprep.subr.bf16.mxu1 %v1220_v2  ;;  %v1235_v15 = vunpack.c.l.s8.bf16 %v1139_v10 }
 0x30d   :  { %1326 = vmatpush1.bf16.msra.mxu0 %v1217_v18  ;;  %1408 = vmatpush1.bf16.msra.mxu1 %v1219_v19  ;;  %v1142_v18 = vld [vmem:[#allocation9 + $0x128] sm:$0xff]  ;;  %v1144_v19 = vld [vmem:[#allocation9 + $0x138] sm:$0xff] }
 0x30e   :  { %1327 = vmatprep.subr.bf16.mxu0 %v1222_v4  ;;  %1409 = vmatprep.subr.bf16.mxu1 %v1224_v20  ;;  %v1237_v20 = vunpack.c.h.s8.bf16 %v1137_v5  ;;  %v1244_v22 = vunpack.c.l.s8.bf16 %v1144_v19 }
 0x311   :  { %1328 = vmatpush1.bf16.msra.mxu0 %v1221_v21  ;;  %1410 = vmatpush1.bf16.msra.mxu1 %v1223_v7  ;;  %v1239_v21 = vunpack.c.h.s8.bf16 %v1139_v10  ;;  %v1242_v7 = vunpack.c.l.s8.bf16 %v1142_v18  ;;  %v1153_v10 = vld [vmem:[#allocation9 + $0x180] sm:$0xff] }
 0x312   :  { %1329 = vmatprep.subr.bf16.mxu0 %v1226_v23  ;;  %1411 = vmatprep.subr.bf16.mxu1 %v1228_v27  ;;  %v1141_v23 = vld [vmem:[#allocation9 + $0x120] sm:$0xff]  ;;  %v1246_v27 = vunpack.c.h.s8.bf16 %v1142_v18 }
 0x313   :  { %v1241_v25 = vunpack.c.l.s8.bf16 %v1141_v23 }
 0x315   :  { %1330 = vmatpush1.bf16.msra.mxu0 %v1225_v28  ;;  %1412 = vmatpush1.bf16.msra.mxu1 %v1227_v29  ;;  %v1248_v28 = vunpack.c.h.s8.bf16 %v1144_v19  ;;  %v1146_v29 = vld [vmem:[#allocation9 + $0x148] sm:$0xff] }
 0x316   :  { %1331 = vmatprep.subr.bf16.mxu0 %v1230_v30  ;;  %1413 = vmatprep.subr.bf16.mxu1 %v1232_v31  ;;  %v1148_v30 = vld [vmem:[#allocation9 + $0x158] sm:$0xff]  ;;  %v1245_v31 = vunpack.c.h.s8.bf16 %v1141_v23 }
 0x317   :  { %v1252_v34 = vunpack.c.l.s8.bf16 %v1148_v30 }
 0x319   :  { %1332 = vmatpush1.bf16.msra.mxu0 %v1229_v32  ;;  %1414 = vmatpush1.bf16.msra.mxu1 %v1231_v33  ;;  %v1247_v32 = vunpack.c.h.s8.bf16 %v1143_v24  ;;  %v1250_v33 = vunpack.c.l.s8.bf16 %v1146_v29 }
 0x31a   :  { %1342 = vmatprep.subr.bf16.mxu0 %v1234_v36  ;;  %1424 = vmatprep.subr.bf16.mxu1 %v1236_v37  ;;  %v1147_v36 = vld [vmem:[#allocation9 + $0x150] sm:$0xff]  ;;  %v1249_v37 = vunpack.c.l.s8.bf16 %v1145_v35 }
 0x3af   :  { %v972_v48 = vpop.f32.mrb[8].mxu0  ;;  %v2595_v49 = vpop.f32.mrb[8].mxu1 }
 0x3b0   :  { %v1077_v54 = vmul.f32 %v1064_v42, %v972_v48  ;;  %v974_v56 = vpop.f32.mrb[9].mxu0  ;;  %v1056_v57 = vpop.f32.mrb[9].mxu1  ;;  %v1251_v42 = vunpack.c.l.s8.bf16 %v1147_v36  ;;  %v1152_v48 = vld [vmem:[#allocation9 + $0x178] sm:$0xff] }
 0x3b1   :  { %v1078_v58 = vmul.f32 %v1068_v43, %v974_v56  ;;  %v1080_v59 = vmul.f32 %v1076_v45, %v1056_v57  ;;  %v976_v60 = vpop.f32.mrb[10].mxu0  ;;  %v1058_v61 = vpop.f32.mrb[10].mxu1  ;;  %v1254_v43 = vunpack.c.h.s8.bf16 %v1146_v29  ;;  %v1256_v45 = vunpack.c.h.s8.bf16 %v1148_v30  ;;  %v1149_v57 = vld [vmem:[#allocation9 + $0x160] sm:$0xff] }
 0x3b2   :  { %v1097_v62 = vadd.f32 %v1084_v47, %v1077_v54  ;;  %v977_v63 = vpop.f32.mrb[11].mxu0  ;;  %v1059_v1 = vpop.f32.mrb[11].mxu1  ;;  %v1150_v47 = vld [vmem:[#allocation9 + $0x168] sm:$0xff]  ;;  %v1260_v56 = vunpack.c.l.s8.bf16 %v1152_v48 }
 0x3b3   :  { %v1098_v8 = vadd.f32 %v1088_v51, %v1078_v58  ;;  %v1100_v6 = vadd.f32 %v1096_v53, %v1080_v59  ;;  %v1253_v51 = vunpack.c.h.s8.bf16 %v1145_v35  ;;  %v1255_v53 = vunpack.c.h.s8.bf16 %v1147_v36  ;;  %v1151_v58 = vld [vmem:[#allocation9 + $0x170] sm:$0xff]  ;;  %v1154_v63 = vld [vmem:[#allocation9 + $0x188] sm:$0xff]  ;;  %v1156_v1 = vld [vmem:[#allocation9 + $0x198] sm:$0xff] }
 0x3b4   :  { %v1101_v9 = vmax.f32 %v1097_v62, 0.0  ;;  %v1258_v54 = vunpack.c.l.s8.bf16 %v1150_v47  ;;  %v1257_v59 = vunpack.c.l.s8.bf16 %v1149_v57  ;;  %v1259_v60 = vunpack.c.l.s8.bf16 %v1151_v58 }
 0x3b5   :  { %v1102_v11 = vmax.f32 %v1098_v8, 0.0  ;;  %v1104_v12 = vmax.f32 %v1100_v6, 0.0  ;;  %v1262_v61 = vunpack.c.h.s8.bf16 %v1150_v47  ;;  %v1264_v62 = vunpack.c.h.s8.bf16 %v1152_v48 }
 0x3b6   :  { %v1297_v2 = vpack.c.bf16 %v1101_v9, %v1101_v9  ;;  %v1261_v8 = vunpack.c.h.s8.bf16 %v1149_v57  ;;  %v1263_v6 = vunpack.c.h.s8.bf16 %v1151_v58  ;;  %v1266_v9 = vunpack.c.l.s8.bf16 %v1154_v63  ;;  %v1167_v57 = vld [vmem:[#allocation9 + $0x1f0] sm:$0xff] }
 0x3b7   :  { %v1298_v13 = vpack.c.bf16 %v1102_v11, %v1102_v11  ;;  %v1300_v4 = vpack.c.bf16 %v1104_v12, %v1104_v12  ;;  %v1268_v5 = vunpack.c.l.s8.bf16 %v1156_v1  ;;  %v1155_v11 = vld [vmem:[#allocation9 + $0x190] sm:$0xff]  ;;  %v1265_v12 = vunpack.c.l.s8.bf16 %v1153_v10 }
 0x3b8   :  { %v1271_v18 = vunpack.c.h.s8.bf16 %v1155_v11 }
 0x3b9   :  { %1333 = vmatprep.mubr.bf16.mxu0 %v1298_v13  ;;  %1415 = vmatprep.mubr.bf16.mxu1 %v1298_v13  ;;  %v1267_v13 = vunpack.c.l.s8.bf16 %v1155_v11 }
 0x3ba   :  { %1334 = vmatmul.mubr.bf16.vlgmr.msra.gmra.mrb[12].mxu0 %v1297_v2  ;;  %1416 = vmatmul.mubr.bf16.vlgmr.msra.gmra.mrb[12].mxu1 %v1297_v2  ;;  %v1158_v2 = vld [vmem:[#allocation9 + $0x1a8] sm:$0xff] }
 0x3bb   :  { %1343 = vmatpush1.bf16.msra.mxu0 %v1233_v14  ;;  %1425 = vmatpush1.bf16.msra.mxu1 %v1235_v15  ;;  %v1270_v14 = vunpack.c.h.s8.bf16 %v1154_v63  ;;  %v1272_v15 = vunpack.c.h.s8.bf16 %v1156_v1  ;;  %v1274_v19 = vunpack.c.l.s8.bf16 %v1158_v2  ;;  %v1278_v23 = vunpack.c.h.s8.bf16 %v1158_v2  ;;  %v1510_v63 = vld [vmem:[#allocation10 + $0x8] sm:$0xff] }
 0x3bc   :  { %1374 = vmatprep.mubr.bf16.mxu0 %v1300_v4  ;;  %1456 = vmatprep.mubr.bf16.mxu1 %v1300_v4  ;;  %v1295_v1 = vunpack.c.h.s8.bf16 %v1167_v57  ;;  %v1514_v2 = vld [vmem:[#allocation10 + $0x28] sm:$0xff] }
 0x3bd   :  { %1344 = vmatprep.subr.bf16.mxu0 %v1238_v16  ;;  %1426 = vmatprep.subr.bf16.mxu1 %v1240_v17  ;;  %v1160_v16 = vld [vmem:[#allocation9 + $0x1b8] sm:$0xff]  ;;  %v1269_v17 = vunpack.c.h.s8.bf16 %v1153_v10  ;;  %v1511_v10 = vld [vmem:[#allocation10 + $0x10] sm:$0xff] }
 0x3be   :  { %v1276_v4 = vunpack.c.l.s8.bf16 %v1160_v16  ;;  %v1280_v24 = vunpack.c.h.s8.bf16 %v1160_v16  ;;  %v1516_v16 = vld [vmem:[#allocation10 + $0x38] sm:$0xff] }
 0x3bf   :  { %1345 = vmatpush1.bf16.msra.mxu0 %v1237_v20  ;;  %1427 = vmatpush1.bf16.msra.mxu1 %v1239_v21  ;;  %v1157_v20 = vld [vmem:[#allocation9 + $0x1a0] sm:$0xff]  ;;  %v1159_v21 = vld [vmem:[#allocation9 + $0x1b0] sm:$0xff] }
 0x3c0   :  { %1346 = vmatprep.subr.bf16.mxu0 %v1242_v7  ;;  %1428 = vmatprep.subr.bf16.mxu1 %v1244_v22  ;;  %v1273_v7 = vunpack.c.l.s8.bf16 %v1157_v20  ;;  %v1275_v22 = vunpack.c.l.s8.bf16 %v1159_v21 }
 0x3c3   :  { %1347 = vmatpush1.bf16.msra.mxu0 %v1241_v25  ;;  %1429 = vmatpush1.bf16.msra.mxu1 %v1243_v26  ;;  %v1162_v25 = vld [vmem:[#allocation9 + $0x1c8] sm:$0xff]  ;;  %v1164_v26 = vld [vmem:[#allocation9 + $0x1d8] sm:$0xff] }
 0x3c4   :  { %1348 = vmatprep.subr.bf16.mxu0 %v1246_v27  ;;  %1430 = vmatprep.subr.bf16.mxu1 %v1248_v28  ;;  %v1277_v27 = vunpack.c.h.s8.bf16 %v1157_v20  ;;  %v1279_v28 = vunpack.c.h.s8.bf16 %v1159_v21  ;;  %v1282_v29 = vunpack.c.l.s8.bf16 %v1162_v25  ;;  %v1284_v30 = vunpack.c.l.s8.bf16 %v1164_v26  ;;  %v1513_v20 = vld [vmem:[#allocation10 + $0x20] sm:$0xff]  ;;  %v1515_v21 = vld [vmem:[#allocation10 + $0x30] sm:$0xff] }
 0x3c7   :  { %1349 = vmatpush1.bf16.msra.mxu0 %v1245_v31  ;;  %1431 = vmatpush1.bf16.msra.mxu1 %v1247_v32  ;;  %v1161_v31 = vld [vmem:[#allocation9 + $0x1c0] sm:$0xff]  ;;  %v1163_v32 = vld [vmem:[#allocation9 + $0x1d0] sm:$0xff] }
 0x3c8   :  { %1350 = vmatprep.subr.bf16.mxu0 %v1250_v33  ;;  %1432 = vmatprep.subr.bf16.mxu1 %v1252_v34  ;;  %v2605_v33 = vld [vmem:[#allocation13 + $0x30] sm:$0xff]  ;;  %v1281_v34 = vunpack.c.l.s8.bf16 %v1161_v31  ;;  %v1283_v35 = vunpack.c.l.s8.bf16 %v1163_v32  ;;  %v1285_v47 = vunpack.c.h.s8.bf16 %v1161_v31  ;;  %v1287_v48 = vunpack.c.h.s8.bf16 %v1163_v32  ;;  %v1517_v31 = vld [vmem:[#allocation10 + $0x40] sm:$0xff] }
 0x3c9   :  { %v1072_v36 = vrot.slane %v2605_v33, %v2532_v3  ;;  %v1165_v3 = vld [vmem:[#allocation9 + $0x1e0] sm:$0xff]  ;;  %v1519_v32 = vld [vmem:[#allocation10 + $0x50] sm:$0xff] }
 0x3ca   :  { %v1289_v58 = vunpack.c.l.s8.bf16 %v1165_v3 }
 0x3cb   :  { %1351 = vmatpush1.bf16.msra.mxu0 %v1249_v37  ;;  %1433 = vmatpush1.bf16.msra.mxu1 %v1251_v42  ;;  %v1286_v37 = vunpack.c.h.s8.bf16 %v1162_v25  ;;  %v1288_v42 = vunpack.c.h.s8.bf16 %v1164_v26  ;;  %v1518_v25 = vld [vmem:[#allocation10 + $0x48] sm:$0xff]  ;;  %v1520_v26 = vld [vmem:[#allocation10 + $0x58] sm:$0xff] }
 0x3cc   :  { %1352 = vmatprep.subr.bf16.mxu0 %v1254_v43  ;;  %1434 = vmatprep.subr.bf16.mxu1 %v1256_v45  ;;  %v1166_v43 = vld [vmem:[#allocation9 + $0x1e8] sm:$0xff]  ;;  %v1168_v45 = vld [vmem:[#allocation9 + $0x1f8] sm:$0xff] }
 0x3cf   :  { %1353 = vmatpush1.bf16.msra.mxu0 %v1253_v51  ;;  %1435 = vmatpush1.bf16.msra.mxu1 %v1255_v53  ;;  %v1079_v51 = vmul.f32 %v1072_v36, %v2595_v49  ;;  %v1092_v53 = vrot.slane %v2571_v44, %v2579_v39  ;;  %v1512_v49 = vld [vmem:[#allocation10 + $0x18] sm:$0xff]  ;;  %v1293_v44 = vunpack.c.h.s8.bf16 %v1165_v3  ;;  %v1594_v36 = vunpack.c.h.s8.bf16 %v1518_v25 }
 0x3d0   :  { %1354 = vmatprep.subr.bf16.mxu0 %v1258_v54  ;;  %1436 = vmatprep.subr.bf16.mxu1 %v1260_v56  ;;  %v1290_v54 = vunpack.c.l.s8.bf16 %v1166_v43  ;;  %v1292_v56 = vunpack.c.l.s8.bf16 %v1168_v45 }
 0x3d3   :  { %1355 = vmatpush1.bf16.msra.mxu0 %v1257_v59  ;;  %1437 = vmatpush1.bf16.msra.mxu1 %v1259_v60  ;;  %v1291_v59 = vunpack.c.l.s8.bf16 %v1167_v57  ;;  %v1099_v60 = vadd.f32 %v1092_v53, %v1079_v51  ;;  %v1521_v53 = vld [vmem:[#allocation10 + $0x60] sm:$0xff] }
 0x3d4   :  { %1356 = vmatprep.subr.bf16.mxu0 %v1262_v61  ;;  %1438 = vmatprep.subr.bf16.mxu1 %v1264_v62  ;;  %v1294_v61 = vunpack.c.h.s8.bf16 %v1166_v43  ;;  %v1296_v62 = vunpack.c.h.s8.bf16 %v1168_v45  ;;  %v1524_v43 = vld [vmem:[#allocation10 + $0x78] sm:$0xff]  ;;  %v1593_v45 = vunpack.c.h.s8.bf16 %v1517_v31 }
 0x3d5   :  { %v1600_v51 = vunpack.c.l.s8.bf16 %v1524_v43 }
 0x3d7   :  { %1357 = vmatpush1.bf16.msra.mxu0 %v1261_v8  ;;  %1439 = vmatpush1.bf16.msra.mxu1 %v1263_v6  ;;  %v1103_v8 = vmax.f32 %v1099_v60, 0.0  ;;  %v1574_v6 = vunpack.c.l.s8.bf16 %v1510_v63  ;;  %v1528_v60 = vld [vmem:[#allocation10 + $0x98] sm:$0xff] }
 0x3d8   :  { %1358 = vmatprep.subr.bf16.mxu0 %v1266_v9  ;;  %1440 = vmatprep.subr.bf16.mxu1 %v1268_v5  ;;  %v1576_v9 = vunpack.c.l.s8.bf16 %v1512_v49  ;;  %v1509_v5 = vld [vmem:[#allocation10] sm:$0xff] }
 0x3d9   :  { %v1573_v11 = vunpack.c.l.s8.bf16 %v1509_v5 }
 0x3db   :  { %1359 = vmatpush1.bf16.msra.mxu0 %v1265_v12  ;;  %1441 = vmatpush1.bf16.msra.mxu1 %v1267_v13  ;;  %v1575_v12 = vunpack.c.l.s8.bf16 %v1511_v10  ;;  %v1299_v13 = vpack.c.bf16 %v1103_v8, %v1103_v8 }
 0x3dc   :  { %1360 = vmatprep.subr.bf16.mxu0 %v1270_v14  ;;  %1442 = vmatprep.subr.bf16.mxu1 %v1272_v15  ;;  %v1578_v14 = vunpack.c.h.s8.bf16 %v1510_v63  ;;  %v1580_v15 = vunpack.c.h.s8.bf16 %v1512_v49  ;;  %v1608_v49 = vunpack.c.l.s8.bf16 %v1528_v60 }
 0x3df   :  { %1361 = vmatpush1.bf16.msra.mxu0 %v1269_v17  ;;  %1443 = vmatpush1.bf16.msra.mxu1 %v1271_v18  ;;  %v1577_v17 = vunpack.c.h.s8.bf16 %v1509_v5  ;;  %v1579_v18 = vunpack.c.h.s8.bf16 %v1511_v10  ;;  %v1612_v5 = vunpack.c.h.s8.bf16 %v1528_v60  ;;  %v1530_v10 = vld [vmem:[#allocation10 + $0xa8] sm:$0xff]  ;;  %v1468_v60 = vrot.slane %v2576_v38, %v2557_v55 }
 0x3e0   :  { %1362 = vmatprep.subr.bf16.mxu0 %v1274_v19  ;;  %1444 = vmatprep.subr.bf16.mxu1 %v1276_v4  ;;  %v1582_v19 = vunpack.c.l.s8.bf16 %v1514_v2  ;;  %v1584_v4 = vunpack.c.l.s8.bf16 %v1516_v16 }
 0x3e3   :  { %1363 = vmatpush1.bf16.msra.mxu0 %v1273_v7  ;;  %1445 = vmatpush1.bf16.msra.mxu1 %v1275_v22  ;;  %v1581_v7 = vunpack.c.l.s8.bf16 %v1513_v20  ;;  %v1583_v22 = vunpack.c.l.s8.bf16 %v1515_v21 }
 0x3e4   :  { %1364 = vmatprep.subr.bf16.mxu0 %v1278_v23  ;;  %1446 = vmatprep.subr.bf16.mxu1 %v1280_v24  ;;  %v1586_v23 = vunpack.c.h.s8.bf16 %v1514_v2  ;;  %v1588_v24 = vunpack.c.h.s8.bf16 %v1516_v16  ;;  %v1529_v2 = vld [vmem:[#allocation10 + $0xa0] sm:$0xff]  ;;  %v1531_v16 = vld [vmem:[#allocation10 + $0xb0] sm:$0xff] }
 0x3e7   :  { %1365 = vmatpush1.bf16.msra.mxu0 %v1277_v27  ;;  %1447 = vmatpush1.bf16.msra.mxu1 %v1279_v28  ;;  %v1585_v27 = vunpack.c.h.s8.bf16 %v1513_v20  ;;  %v1587_v28 = vunpack.c.h.s8.bf16 %v1515_v21  ;;  %v1534_v20 = vld [vmem:[#allocation10 + $0xc8] sm:$0xff]  ;;  %v1536_v21 = vld [vmem:[#allocation10 + $0xd8] sm:$0xff] }
 0x3e8   :  { %1366 = vmatprep.subr.bf16.mxu0 %v1282_v29  ;;  %1448 = vmatprep.subr.bf16.mxu1 %v1284_v30  ;;  %v1590_v29 = vunpack.c.l.s8.bf16 %v1518_v25  ;;  %v1592_v30 = vunpack.c.l.s8.bf16 %v1520_v26  ;;  %v1533_v25 = vld [vmem:[#allocation10 + $0xc0] sm:$0xff] }
 0x3eb   :  { %1367 = vmatpush1.bf16.msra.mxu0 %v1281_v34  ;;  %1449 = vmatpush1.bf16.msra.mxu1 %v1283_v35  ;;  %v1589_v34 = vunpack.c.l.s8.bf16 %v1517_v31  ;;  %v1591_v35 = vunpack.c.l.s8.bf16 %v1519_v32  ;;  %v1625_v31 = vunpack.c.h.s8.bf16 %v1533_v25 }
 0x3ec   :  { %1368 = vmatprep.subr.bf16.mxu0 %v1286_v37  ;;  %1450 = vmatprep.subr.bf16.mxu1 %v1288_v42  ;;  %v1596_v37 = vunpack.c.h.s8.bf16 %v1520_v26  ;;  %v1522_v42 = vld [vmem:[#allocation10 + $0x68] sm:$0xff]  ;;  %v1535_v26 = vld [vmem:[#allocation10 + $0xd0] sm:$0xff] }
 0x3ed   :  { %v1602_v57 = vunpack.c.h.s8.bf16 %v1522_v42 }
 0x3ef   :  { %1369 = vmatpush1.bf16.msra.mxu0 %v1285_v47  ;;  %1451 = vmatpush1.bf16.msra.mxu1 %v1287_v48  ;;  %v1595_v47 = vunpack.c.h.s8.bf16 %v1519_v32  ;;  %v1598_v48 = vunpack.c.l.s8.bf16 %v1522_v42  ;;  %v1627_v32 = vunpack.c.h.s8.bf16 %v1535_v26  ;;  %v1537_v42 = vld [vmem:[#allocation10 + $0xe0] sm:$0xff] }
 0x3f0   :  { %1370 = vmatprep.subr.bf16.mxu0 %v1290_v54  ;;  %1452 = vmatprep.subr.bf16.mxu1 %v1292_v56  ;;  %v1523_v54 = vld [vmem:[#allocation10 + $0x70] sm:$0xff]  ;;  %v1597_v56 = vunpack.c.l.s8.bf16 %v1521_v53 }
 0x3f1   :  { %v1599_v3 = vunpack.c.l.s8.bf16 %v1523_v54 }
 0x3f3   :  { %1371 = vmatpush1.bf16.msra.mxu0 %v1289_v58  ;;  %1453 = vmatpush1.bf16.msra.mxu1 %v1291_v59  ;;  %v1604_v58 = vunpack.c.h.s8.bf16 %v1524_v43  ;;  %v1526_v59 = vld [vmem:[#allocation10 + $0x88] sm:$0xff]  ;;  %v1539_v43 = vld [vmem:[#allocation10 + $0xf0] sm:$0xff] }
 0x3f4   :  { %1372 = vmatprep.subr.bf16.mxu0 %v1294_v61  ;;  %1454 = vmatprep.subr.bf16.mxu1 %v1296_v62  ;;  %v1601_v61 = vunpack.c.h.s8.bf16 %v1521_v53  ;;  %v1603_v62 = vunpack.c.h.s8.bf16 %v1523_v54  ;;  %v1606_v63 = vunpack.c.l.s8.bf16 %v1526_v59  ;;  %v1633_v53 = vunpack.c.h.s8.bf16 %v1537_v42 }
 0x3f5   :  { %v1635_v54 = vunpack.c.h.s8.bf16 %v1539_v43 }
 0x3f7   :  { %1373 = vmatpush1.bf16.msra.mxu0 %v1293_v44  ;;  %1455 = vmatpush1.bf16.msra.mxu1 %v1295_v1  ;;  %v1525_v44 = vld [vmem:[#allocation10 + $0x80] sm:$0xff]  ;;  %v1527_v1 = vld [vmem:[#allocation10 + $0x90] sm:$0xff] }
 0x3f8   :  { %1705 = vmatprep.subr.bf16.mxu0 %v1574_v6  ;;  %1787 = vmatprep.subr.bf16.mxu1 %v1576_v9  ;;  %v1605_v8 = vunpack.c.l.s8.bf16 %v1525_v44  ;;  %v1607_v6 = vunpack.c.l.s8.bf16 %v1527_v1  ;;  %v1610_v9 = vunpack.c.h.s8.bf16 %v1526_v59  ;;  %v2613_v59 = vsub.s32 3, %v2526_v0 }
 0x3fa   :  { %1375 = vmatmul.mubr.bf16.vlgmr.msra.gmra.mrb[12].mxu0 %v1299_v13  ;;  %1457 = vmatmul.mubr.bf16.vlgmr.msra.gmra.mrb[12].mxu1 %v1299_v13  ;;  %v1611_v13 = vunpack.c.h.s8.bf16 %v1527_v1  ;;  %v1492_v1 = vrot.slane %v2597_v50, %v2613_v59 }
 0x3fb   :  { %1706 = vmatpush1.bf16.msra.mxu0 %v1573_v11  ;;  %1788 = vmatpush1.bf16.msra.mxu1 %v1575_v12  ;;  %v1532_v11 = vld [vmem:[#allocation10 + $0xb8] sm:$0xff]  ;;  %v1609_v12 = vunpack.c.h.s8.bf16 %v1525_v44 }
 0x3fc   :  { %1707 = vmatprep.subr.bf16.mxu0 %v1578_v14  ;;  %1789 = vmatprep.subr.bf16.mxu1 %v1580_v15  ;;  %v1614_v14 = vunpack.c.l.s8.bf16 %v1530_v10  ;;  %v1616_v15 = vunpack.c.l.s8.bf16 %v1532_v11 }
 0x3ff   :  { %1708 = vmatpush1.bf16.msra.mxu0 %v1577_v17  ;;  %1790 = vmatpush1.bf16.msra.mxu1 %v1579_v18  ;;  %v1613_v17 = vunpack.c.l.s8.bf16 %v1529_v2  ;;  %v1615_v18 = vunpack.c.l.s8.bf16 %v1531_v16 }
 0x400   :  { %1709 = vmatprep.subr.bf16.mxu0 %v1582_v19  ;;  %1791 = vmatprep.subr.bf16.mxu1 %v1584_v4  ;;  %v1618_v19 = vunpack.c.h.s8.bf16 %v1530_v10  ;;  %v1620_v4 = vunpack.c.h.s8.bf16 %v1532_v11 }
 0x403   :  { %1710 = vmatpush1.bf16.msra.mxu0 %v1581_v7  ;;  %1792 = vmatpush1.bf16.msra.mxu1 %v1583_v22  ;;  %v1617_v7 = vunpack.c.h.s8.bf16 %v1529_v2  ;;  %v1619_v22 = vunpack.c.h.s8.bf16 %v1531_v16  ;;  %v1541_v2 = vld [vmem:[#allocation10 + $0x100] sm:$0xff]  ;;  %v1543_v16 = vld [vmem:[#allocation10 + $0x110] sm:$0xff] }
 0x404   :  { %1711 = vmatprep.subr.bf16.mxu0 %v1586_v23  ;;  %1793 = vmatprep.subr.bf16.mxu1 %v1588_v24  ;;  %v1622_v23 = vunpack.c.l.s8.bf16 %v1534_v20  ;;  %v1624_v24 = vunpack.c.l.s8.bf16 %v1536_v21 }
 0x407   :  { %1712 = vmatpush1.bf16.msra.mxu0 %v1585_v27  ;;  %1794 = vmatpush1.bf16.msra.mxu1 %v1587_v28  ;;  %v1621_v27 = vunpack.c.l.s8.bf16 %v1533_v25  ;;  %v1623_v28 = vunpack.c.l.s8.bf16 %v1535_v26  ;;  %v1643_v25 = vunpack.c.h.s8.bf16 %v1543_v16 }
 0x408   :  { %1713 = vmatprep.subr.bf16.mxu0 %v1590_v29  ;;  %1795 = vmatprep.subr.bf16.mxu1 %v1592_v30  ;;  %v1626_v29 = vunpack.c.h.s8.bf16 %v1534_v20  ;;  %v1628_v30 = vunpack.c.h.s8.bf16 %v1536_v21 }
 0x40b   :  { %1714 = vmatpush1.bf16.msra.mxu0 %v1589_v34  ;;  %1796 = vmatpush1.bf16.msra.mxu1 %v1591_v35  ;;  %v1538_v34 = vld [vmem:[#allocation10 + $0xe8] sm:$0xff]  ;;  %v1540_v35 = vld [vmem:[#allocation10 + $0xf8] sm:$0xff] }
 0x40c   :  { %1715 = vmatprep.subr.bf16.mxu0 %v1594_v36  ;;  %1797 = vmatprep.subr.bf16.mxu1 %v1596_v37  ;;  %v1630_v36 = vunpack.c.l.s8.bf16 %v1538_v34  ;;  %v1632_v37 = vunpack.c.l.s8.bf16 %v1540_v35 }
 0x40f   :  { %1716 = vmatpush1.bf16.msra.mxu0 %v1593_v45  ;;  %1798 = vmatpush1.bf16.msra.mxu1 %v1595_v47  ;;  %v1629_v45 = vunpack.c.l.s8.bf16 %v1537_v42  ;;  %v1631_v47 = vunpack.c.l.s8.bf16 %v1539_v43 }
 0x410   :  { %1717 = vmatprep.subr.bf16.mxu0 %v1598_v48  ;;  %1799 = vmatprep.subr.bf16.mxu1 %v1600_v51  ;;  %v1634_v48 = vunpack.c.h.s8.bf16 %v1538_v34  ;;  %v1636_v51 = vunpack.c.h.s8.bf16 %v1540_v35  ;;  %v1550_v35 = vld [vmem:[#allocation10 + $0x148] sm:$0xff] }
 0x411   :  { %v1654_v43 = vunpack.c.l.s8.bf16 %v1550_v35 }
 0x413   :  { %1718 = vmatpush1.bf16.msra.mxu0 %v1597_v56  ;;  %1800 = vmatpush1.bf16.msra.mxu1 %v1599_v3  ;;  %v1542_v56 = vld [vmem:[#allocation10 + $0x108] sm:$0xff]  ;;  %v1544_v3 = vld [vmem:[#allocation10 + $0x118] sm:$0xff] }
 0x414   :  { %1719 = vmatprep.subr.bf16.mxu0 %v1602_v57  ;;  %1801 = vmatprep.subr.bf16.mxu1 %v1604_v58  ;;  %v1638_v57 = vunpack.c.l.s8.bf16 %v1542_v56  ;;  %v1640_v58 = vunpack.c.l.s8.bf16 %v1544_v3  ;;  %v1642_v20 = vunpack.c.h.s8.bf16 %v1542_v56  ;;  %v1644_v21 = vunpack.c.h.s8.bf16 %v1544_v3  ;;  %v1554_v3 = vld [vmem:[#allocation10 + $0x168] sm:$0xff] }
 0x417   :  { %1720 = vmatpush1.bf16.msra.mxu0 %v1601_v61  ;;  %1802 = vmatpush1.bf16.msra.mxu1 %v1603_v62  ;;  %v1472_v61 = vrot.slane %v2581_v40, %v2557_v55  ;;  %v1480_v62 = vrot.slane %v2583_v41, %v2557_v55 }
 0x418   :  { %1721 = vmatprep.subr.bf16.mxu0 %v1606_v63  ;;  %1803 = vmatprep.subr.bf16.mxu1 %v1608_v49  ;;  %v1488_v63 = vrot.slane %v2591_v46, %v2613_v59 }
 0x41b   :  { %1722 = vmatpush1.bf16.msra.mxu0 %v1605_v8  ;;  %1804 = vmatpush1.bf16.msra.mxu1 %v1607_v6  ;;  %v1500_v8 = vrot.slane %v2601_v52, %v2613_v59  ;;  %v1639_v52 = vunpack.c.l.s8.bf16 %v1543_v16  ;;  %v1562_v16 = vld [vmem:[#allocation10 + $0x1a8] sm:$0xff] }
 0x41c   :  { %1723 = vmatprep.subr.bf16.mxu0 %v1610_v9  ;;  %1805 = vmatprep.subr.bf16.mxu1 %v1612_v5 }
 0x41f   :  { %1724 = vmatpush1.bf16.msra.mxu0 %v1609_v12  ;;  %1806 = vmatpush1.bf16.msra.mxu1 %v1611_v13 }
 0x420   :  { %1725 = vmatprep.subr.bf16.mxu0 %v1614_v14  ;;  %1807 = vmatprep.subr.bf16.mxu1 %v1616_v15 }
 0x423   :  { %1726 = vmatpush1.bf16.msra.mxu0 %v1613_v17  ;;  %1808 = vmatpush1.bf16.msra.mxu1 %v1615_v18 }
 0x424   :  { %1727 = vmatprep.subr.bf16.mxu0 %v1618_v19  ;;  %1809 = vmatprep.subr.bf16.mxu1 %v1620_v4  ;;  %v1637_v19 = vunpack.c.l.s8.bf16 %v1541_v2 }
 0x427   :  { %1728 = vmatpush1.bf16.msra.mxu0 %v1617_v7  ;;  %1810 = vmatpush1.bf16.msra.mxu1 %v1619_v22  ;;  %v1546_v7 = vld [vmem:[#allocation10 + $0x128] sm:$0xff]  ;;  %v1548_v22 = vld [vmem:[#allocation10 + $0x138] sm:$0xff] }
 0x428   :  { %1729 = vmatprep.subr.bf16.mxu0 %v1622_v23  ;;  %1811 = vmatprep.subr.bf16.mxu1 %v1624_v24  ;;  %v1641_v24 = vunpack.c.h.s8.bf16 %v1541_v2  ;;  %v1646_v26 = vunpack.c.l.s8.bf16 %v1546_v7  ;;  %v1652_v34 = vunpack.c.h.s8.bf16 %v1548_v22 }
 0x42b   :  { %1730 = vmatpush1.bf16.msra.mxu0 %v1621_v27  ;;  %1812 = vmatpush1.bf16.msra.mxu1 %v1623_v28  ;;  %v1648_v27 = vunpack.c.l.s8.bf16 %v1548_v22  ;;  %v1545_v28 = vld [vmem:[#allocation10 + $0x120] sm:$0xff]  ;;  %v1682_v22 = vunpack.c.h.s8.bf16 %v1562_v16 }
 0x42c   :  { %1731 = vmatprep.subr.bf16.mxu0 %v1626_v29  ;;  %1813 = vmatprep.subr.bf16.mxu1 %v1628_v30  ;;  %v1547_v29 = vld [vmem:[#allocation10 + $0x130] sm:$0xff]  ;;  %v1645_v30 = vunpack.c.l.s8.bf16 %v1545_v28 }
 0x42d   :  { %v1651_v42 = vunpack.c.h.s8.bf16 %v1547_v29 }
 0x42f   :  { %1732 = vmatpush1.bf16.msra.mxu0 %v1625_v31  ;;  %1814 = vmatpush1.bf16.msra.mxu1 %v1627_v32  ;;  %v1647_v31 = vunpack.c.l.s8.bf16 %v1547_v29  ;;  %v1650_v32 = vunpack.c.h.s8.bf16 %v1546_v7 }
 0x430   :  { %1733 = vmatprep.subr.bf16.mxu0 %v1630_v36  ;;  %1815 = vmatprep.subr.bf16.mxu1 %v1632_v37  ;;  %v1552_v36 = vld [vmem:[#allocation10 + $0x158] sm:$0xff]  ;;  %v1649_v37 = vunpack.c.h.s8.bf16 %v1545_v28 }
 0x431   :  { %v1660_v56 = vunpack.c.h.s8.bf16 %v1552_v36 }
 0x433   :  { %1734 = vmatpush1.bf16.msra.mxu0 %v1629_v45  ;;  %1816 = vmatpush1.bf16.msra.mxu1 %v1631_v47  ;;  %v1656_v45 = vunpack.c.l.s8.bf16 %v1552_v36  ;;  %v1549_v47 = vld [vmem:[#allocation10 + $0x140] sm:$0xff] }
 0x434   :  { %1735 = vmatprep.subr.bf16.mxu0 %v1634_v48  ;;  %1817 = vmatprep.subr.bf16.mxu1 %v1636_v51  ;;  %v1551_v48 = vld [vmem:[#allocation10 + $0x150] sm:$0xff]  ;;  %v1653_v51 = vunpack.c.l.s8.bf16 %v1549_v47 }
 0x437   :  { %1736 = vmatpush1.bf16.msra.mxu0 %v1633_v53  ;;  %1818 = vmatpush1.bf16.msra.mxu1 %v1635_v54  ;;  %v1655_v53 = vunpack.c.l.s8.bf16 %v1551_v48  ;;  %v1658_v54 = vunpack.c.h.s8.bf16 %v1550_v35  ;;  %v1476_v35 = vrot.slane %v2605_v33, %v2557_v55 }
 0x438   :  { %1746 = vmatprep.subr.bf16.mxu0 %v1638_v57  ;;  %1828 = vmatprep.subr.bf16.mxu1 %v1640_v58  ;;  %v1556_v57 = vld [vmem:[#allocation10 + $0x178] sm:$0xff]  ;;  %v1657_v58 = vunpack.c.h.s8.bf16 %v1549_v47 }
 0x4cd   :  { %v1376_v49 = vpop.f32.mrb[12].mxu0  ;;  %v2623_v44 = vpop.f32.mrb[12].mxu1 }
 0x4ce   :  { %v1481_v6 = vmul.f32 %v1468_v60, %v1376_v49  ;;  %v1378_v38 = vpop.f32.mrb[13].mxu0  ;;  %v1460_v9 = vpop.f32.mrb[13].mxu1  ;;  %v1659_v60 = vunpack.c.h.s8.bf16 %v1551_v48  ;;  %v1555_v49 = vld [vmem:[#allocation10 + $0x170] sm:$0xff]  ;;  %v1483_v48 = vmul.f32 %v1476_v35, %v2623_v44  ;;  %v1928_v35 = vld [vmem:[#allocation12 + $0x78] sm:$0xff] }
 0x4cf   :  { %v1482_v5 = vmul.f32 %v1472_v61, %v1378_v38  ;;  %v1484_v40 = vmul.f32 %v1480_v62, %v1460_v9  ;;  %v1380_v10 = vpop.f32.mrb[14].mxu0  ;;  %v1462_v11 = vpop.f32.mrb[14].mxu1  ;;  %v1662_v61 = vunpack.c.l.s8.bf16 %v1554_v3  ;;  %v1664_v62 = vunpack.c.l.s8.bf16 %v1556_v57  ;;  %v1558_v9 = vld [vmem:[#allocation10 + $0x188] sm:$0xff] }
 0x4d0   :  { %v1501_v41 = vadd.f32 %v1488_v63, %v1481_v6  ;;  %v1381_v12 = vpop.f32.mrb[15].mxu0  ;;  %v1463_v13 = vpop.f32.mrb[15].mxu1  ;;  %v1553_v63 = vld [vmem:[#allocation10 + $0x160] sm:$0xff]  ;;  %v1666_v6 = vunpack.c.h.s8.bf16 %v1554_v3  ;;  %v1668_v38 = vunpack.c.h.s8.bf16 %v1556_v57  ;;  %v1667_v10 = vunpack.c.h.s8.bf16 %v1555_v49  ;;  %v1571_v3 = vld [vmem:[#allocation10 + $0x1f0] sm:$0xff] }
 0x4d1   :  { %v1502_v46 = vadd.f32 %v1492_v1, %v1482_v5  ;;  %v1504_v14 = vadd.f32 %v1500_v8, %v1484_v40  ;;  %v1661_v1 = vunpack.c.l.s8.bf16 %v1553_v63  ;;  %v1663_v8 = vunpack.c.l.s8.bf16 %v1555_v49  ;;  %v1560_v5 = vld [vmem:[#allocation10 + $0x198] sm:$0xff]  ;;  %v1557_v12 = vld [vmem:[#allocation10 + $0x180] sm:$0xff]  ;;  %v1559_v13 = vld [vmem:[#allocation10 + $0x190] sm:$0xff] }
 0x4d2   :  { %v1505_v15 = vmax.f32 %v1501_v41, 0.0  ;;  %v1665_v40 = vunpack.c.h.s8.bf16 %v1553_v63  ;;  %v1670_v11 = vunpack.c.l.s8.bf16 %v1558_v9  ;;  %v1672_v41 = vunpack.c.l.s8.bf16 %v1560_v5  ;;  %v1925_v63 = vld [vmem:[#allocation12 + $0x60] sm:$0xff] }
 0x4d3   :  { %v1506_v17 = vmax.f32 %v1502_v46, 0.0  ;;  %v1508_v50 = vmax.f32 %v1504_v14, 0.0  ;;  %v1669_v46 = vunpack.c.l.s8.bf16 %v1557_v12  ;;  %v1671_v14 = vunpack.c.l.s8.bf16 %v1559_v13 }
 0x4d4   :  { %v1701_v4 = vpack.c.bf16 %v1505_v15, %v1505_v15  ;;  %v1674_v15 = vunpack.c.h.s8.bf16 %v1558_v9  ;;  %v1676_v2 = vunpack.c.h.s8.bf16 %v1560_v5  ;;  %v1913_v9 = vld [vmem:[#allocation12] sm:$0xff] }
 0x4d5   :  { %v1702_v18 = vpack.c.bf16 %v1506_v17, %v1506_v17  ;;  %v1704_v23 = vpack.c.bf16 %v1508_v50, %v1508_v50  ;;  %v1564_v17 = vld [vmem:[#allocation10 + $0x1b8] sm:$0xff]  ;;  %v1673_v50 = vunpack.c.h.s8.bf16 %v1557_v12  ;;  %v1921_v5 = vld [vmem:[#allocation12 + $0x40] sm:$0xff]  ;;  %v1954_v12 = vunpack.c.h.s8.bf16 %v1925_v63 }
 0x4d7   :  { %1737 = vmatprep.mubr.bf16.mxu0 %v1702_v18  ;;  %1819 = vmatprep.mubr.bf16.mxu1 %v1702_v18  ;;  %v1675_v18 = vunpack.c.h.s8.bf16 %v1559_v13  ;;  %v1918_v13 = vld [vmem:[#allocation12 + $0x28] sm:$0xff] }
 0x4d8   :  { %1738 = vmatmul.mubr.bf16.vlgmr.msra.gmra.mrb[16].mxu0 %v1701_v4  ;;  %1820 = vmatmul.mubr.bf16.vlgmr.msra.gmra.mrb[16].mxu1 %v1701_v4  ;;  %v1561_v4 = vld [vmem:[#allocation10 + $0x1a0] sm:$0xff] }
 0x4d9   :  { %1747 = vmatpush1.bf16.msra.mxu0 %v1637_v19  ;;  %1829 = vmatpush1.bf16.msra.mxu1 %v1639_v52  ;;  %v1678_v19 = vunpack.c.l.s8.bf16 %v1562_v16  ;;  %v1680_v52 = vunpack.c.l.s8.bf16 %v1564_v17 }
 0x4da   :  { %1778 = vmatprep.mubr.bf16.mxu0 %v1704_v23  ;;  %1860 = vmatprep.mubr.bf16.mxu1 %v1704_v23  ;;  %v1684_v23 = vunpack.c.h.s8.bf16 %v1564_v17  ;;  %v1914_v17 = vld [vmem:[#allocation12 + $0x8] sm:$0xff] }
 0x4db   :  { %1748 = vmatprep.subr.bf16.mxu0 %v1642_v20  ;;  %1830 = vmatprep.subr.bf16.mxu1 %v1644_v21  ;;  %v1563_v20 = vld [vmem:[#allocation10 + $0x1b0] sm:$0xff]  ;;  %v1677_v21 = vunpack.c.l.s8.bf16 %v1561_v4 }
 0x4dc   :  { %v1679_v7 = vunpack.c.l.s8.bf16 %v1563_v20 }
 0x4dd   :  { %1749 = vmatpush1.bf16.msra.mxu0 %v1641_v24  ;;  %1831 = vmatpush1.bf16.msra.mxu1 %v1643_v25  ;;  %v1566_v24 = vld [vmem:[#allocation10 + $0x1c8] sm:$0xff]  ;;  %v1568_v25 = vld [vmem:[#allocation10 + $0x1d8] sm:$0xff] }
 0x4de   :  { %1750 = vmatprep.subr.bf16.mxu0 %v1646_v26  ;;  %1832 = vmatprep.subr.bf16.mxu1 %v1648_v27  ;;  %v1681_v26 = vunpack.c.h.s8.bf16 %v1561_v4  ;;  %v1683_v27 = vunpack.c.h.s8.bf16 %v1563_v20  ;;  %v1686_v28 = vunpack.c.l.s8.bf16 %v1566_v24  ;;  %v1688_v29 = vunpack.c.l.s8.bf16 %v1568_v25  ;;  %v1919_v20 = vld [vmem:[#allocation12 + $0x30] sm:$0xff] }
 0x4df   :  { %v1690_v36 = vunpack.c.h.s8.bf16 %v1566_v24 }
 0x4e1   :  { %1751 = vmatpush1.bf16.msra.mxu0 %v1645_v30  ;;  %1833 = vmatpush1.bf16.msra.mxu1 %v1647_v31  ;;  %v1565_v30 = vld [vmem:[#allocation10 + $0x1c0] sm:$0xff]  ;;  %v1567_v31 = vld [vmem:[#allocation10 + $0x1d0] sm:$0xff] }
 0x4e2   :  { %1752 = vmatprep.subr.bf16.mxu0 %v1650_v32  ;;  %1834 = vmatprep.subr.bf16.mxu1 %v1652_v34  ;;  %v1685_v32 = vunpack.c.l.s8.bf16 %v1565_v30  ;;  %v1687_v34 = vunpack.c.l.s8.bf16 %v1567_v31  ;;  %v1691_v47 = vunpack.c.h.s8.bf16 %v1567_v31 }
 0x4e5   :  { %1753 = vmatpush1.bf16.msra.mxu0 %v1649_v37  ;;  %1835 = vmatpush1.bf16.msra.mxu1 %v1651_v42  ;;  %v1692_v37 = vunpack.c.h.s8.bf16 %v1568_v25  ;;  %v1570_v42 = vld [vmem:[#allocation10 + $0x1e8] sm:$0xff]  ;;  %v1915_v25 = vld [vmem:[#allocation12 + $0x10] sm:$0xff] }
 0x4e6   :  { %1754 = vmatprep.subr.bf16.mxu0 %v1654_v43  ;;  %1836 = vmatprep.subr.bf16.mxu1 %v1656_v45  ;;  %v1572_v43 = vld [vmem:[#allocation10 + $0x1f8] sm:$0xff]  ;;  %v1689_v45 = vunpack.c.h.s8.bf16 %v1565_v30  ;;  %v1694_v55 = vunpack.c.l.s8.bf16 %v1570_v42  ;;  %v1934_v31 = vunpack.c.h.s8.bf16 %v1915_v25 }
 0x4e7   :  { %v1700_v44 = vunpack.c.h.s8.bf16 %v1572_v43 }
 0x4e9   :  { %1755 = vmatpush1.bf16.msra.mxu0 %v1653_v51  ;;  %1837 = vmatpush1.bf16.msra.mxu1 %v1655_v53  ;;  %v2632_v51 = vld [vmem:[#allocation13 + $0x10] sm:$0xff] }
 0x4ea   :  { %1756 = vmatprep.subr.bf16.mxu0 %v1658_v54  ;;  %1838 = vmatprep.subr.bf16.mxu1 %v1660_v56  ;;  %v1496_v53 = vrot.slane %v2632_v51, %v2613_v59  ;;  %v1696_v54 = vunpack.c.l.s8.bf16 %v1572_v43  ;;  %v1569_v56 = vld [vmem:[#allocation10 + $0x1e0] sm:$0xff]  ;;  %v1924_v43 = vld [vmem:[#allocation12 + $0x58] sm:$0xff] }
 0x4eb   :  { %v1693_v57 = vunpack.c.l.s8.bf16 %v1569_v56  ;;  %v1697_v49 = vunpack.c.h.s8.bf16 %v1569_v56  ;;  %v1891_v56 = vsub.s32 4, %v2526_v0 }
 0x4ed   :  { %1757 = vmatpush1.bf16.msra.mxu0 %v1657_v58  ;;  %1839 = vmatpush1.bf16.msra.mxu1 %v1659_v60  ;;  %v1695_v58 = vunpack.c.l.s8.bf16 %v1571_v3  ;;  %v1503_v60 = vadd.f32 %v1496_v53, %v1483_v48  ;;  %v1960_v53 = vunpack.c.h.s8.bf16 %v1928_v35 }
 0x4ee   :  { %1758 = vmatprep.subr.bf16.mxu0 %v1662_v61  ;;  %1840 = vmatprep.subr.bf16.mxu1 %v1664_v62  ;;  %v1698_v61 = vunpack.c.h.s8.bf16 %v1570_v42  ;;  %v1917_v62 = vld [vmem:[#allocation12 + $0x20] sm:$0xff]  ;;  %v1916_v42 = vld [vmem:[#allocation12 + $0x18] sm:$0xff] }
 0x4f1   :  { %1759 = vmatpush1.bf16.msra.mxu0 %v1661_v1  ;;  %1841 = vmatpush1.bf16.msra.mxu1 %v1663_v8  ;;  %v1699_v1 = vunpack.c.h.s8.bf16 %v1571_v3  ;;  %v1507_v8 = vmax.f32 %v1503_v60, 0.0  ;;  %v2162_v3 = vld [vmem:[#allocation13 + $0x20] sm:$0xff]  ;;  %v2163_v60 = vld [vmem:[#allocation13 + $0x28] sm:$0xff] }
 0x4f2   :  { %1760 = vmatprep.subr.bf16.mxu0 %v1666_v6  ;;  %1842 = vmatprep.subr.bf16.mxu1 %v1668_v38  ;;  %v1937_v6 = vunpack.c.l.s8.bf16 %v1917_v62  ;;  %v1953_v38 = vunpack.c.l.s8.bf16 %v1925_v63  ;;  %v2165_v63 = vld [vmem:[#allocation13] sm:$0xff] }
 0x4f5   :  { %1761 = vmatpush1.bf16.msra.mxu0 %v1665_v40  ;;  %1843 = vmatpush1.bf16.msra.mxu1 %v1667_v10  ;;  %v1929_v40 = vunpack.c.l.s8.bf16 %v1913_v9  ;;  %v1945_v10 = vunpack.c.l.s8.bf16 %v1921_v5 }
 0x4f6   :  { %1762 = vmatprep.subr.bf16.mxu0 %v1670_v11  ;;  %1844 = vmatprep.subr.bf16.mxu1 %v1672_v41  ;;  %v1703_v11 = vpack.c.bf16 %v1507_v8, %v1507_v8  ;;  %v1938_v41 = vunpack.c.h.s8.bf16 %v1917_v62 }
 0x4f9   :  { %1763 = vmatpush1.bf16.msra.mxu0 %v1669_v46  ;;  %1845 = vmatpush1.bf16.msra.mxu1 %v1671_v14  ;;  %v1926_v46 = vld [vmem:[#allocation12 + $0x68] sm:$0xff]  ;;  %v1930_v14 = vunpack.c.h.s8.bf16 %v1913_v9 }
 0x4fa   :  { %1764 = vmatprep.subr.bf16.mxu0 %v1674_v15  ;;  %1846 = vmatprep.subr.bf16.mxu1 %v1676_v2  ;;  %v1946_v15 = vunpack.c.h.s8.bf16 %v1921_v5  ;;  %v1939_v2 = vunpack.c.l.s8.bf16 %v1918_v13  ;;  %v1955_v16 = vunpack.c.l.s8.bf16 %v1926_v46  ;;  %v1956_v4 = vunpack.c.h.s8.bf16 %v1926_v46  ;;  %v2167_v5 = vld [vmem:[#allocation13 + $0x18] sm:$0xff] }
 0x4fd   :  { %1765 = vmatpush1.bf16.msra.mxu0 %v1673_v50  ;;  %1847 = vmatpush1.bf16.msra.mxu1 %v1675_v18  ;;  %v1922_v50 = vld [vmem:[#allocation12 + $0x48] sm:$0xff]  ;;  %v1931_v18 = vunpack.c.l.s8.bf16 %v1914_v17 }
 0x4fe   :  { %1766 = vmatprep.subr.bf16.mxu0 %v1678_v19  ;;  %1848 = vmatprep.subr.bf16.mxu1 %v1680_v52  ;;  %v1947_v19 = vunpack.c.l.s8.bf16 %v1922_v50  ;;  %v1940_v52 = vunpack.c.h.s8.bf16 %v1918_v13 }
 0x501   :  { %1767 = vmatpush1.bf16.msra.mxu0 %v1677_v21  ;;  %1849 = vmatpush1.bf16.msra.mxu1 %v1679_v7  ;;  %v1927_v21 = vld [vmem:[#allocation12 + $0x70] sm:$0xff]  ;;  %v1932_v7 = vunpack.c.h.s8.bf16 %v1914_v17 }
 0x502   :  { %1768 = vmatprep.subr.bf16.mxu0 %v1682_v22  ;;  %1850 = vmatprep.subr.bf16.mxu1 %v1684_v23  ;;  %v1948_v22 = vunpack.c.h.s8.bf16 %v1922_v50  ;;  %v1941_v23 = vunpack.c.l.s8.bf16 %v1919_v20  ;;  %v1957_v24 = vunpack.c.l.s8.bf16 %v1927_v21  ;;  %v1958_v30 = vunpack.c.h.s8.bf16 %v1927_v21 }
 0x505   :  { %1769 = vmatpush1.bf16.msra.mxu0 %v1681_v26  ;;  %1851 = vmatpush1.bf16.msra.mxu1 %v1683_v27  ;;  %v1923_v26 = vld [vmem:[#allocation12 + $0x50] sm:$0xff]  ;;  %v1933_v27 = vunpack.c.l.s8.bf16 %v1915_v25 }
 0x506   :  { %1770 = vmatprep.subr.bf16.mxu0 %v1686_v28  ;;  %1852 = vmatprep.subr.bf16.mxu1 %v1688_v29  ;;  %v1949_v28 = vunpack.c.l.s8.bf16 %v1923_v26  ;;  %v1942_v29 = vunpack.c.h.s8.bf16 %v1919_v20 }
 0x509   :  { %1771 = vmatpush1.bf16.msra.mxu0 %v1685_v32  ;;  %1853 = vmatpush1.bf16.msra.mxu1 %v1687_v34  ;;  %v1950_v32 = vunpack.c.h.s8.bf16 %v1923_v26  ;;  %v1920_v34 = vld [vmem:[#allocation12 + $0x38] sm:$0xff] }
 0x50a   :  { %1772 = vmatprep.subr.bf16.mxu0 %v1690_v36  ;;  %1854 = vmatprep.subr.bf16.mxu1 %v1692_v37  ;;  %v1943_v36 = vunpack.c.l.s8.bf16 %v1920_v34  ;;  %v1959_v37 = vunpack.c.l.s8.bf16 %v1928_v35  ;;  %v1944_v48 = vunpack.c.h.s8.bf16 %v1920_v34 }
 0x50d   :  { %1773 = vmatpush1.bf16.msra.mxu0 %v1689_v45  ;;  %1855 = vmatpush1.bf16.msra.mxu1 %v1691_v47  ;;  %v1935_v45 = vunpack.c.l.s8.bf16 %v1916_v42  ;;  %v1951_v47 = vunpack.c.l.s8.bf16 %v1924_v43 }
 0x50e   :  { %1774 = vmatprep.subr.bf16.mxu0 %v1694_v55  ;;  %1856 = vmatprep.subr.bf16.mxu1 %v1696_v54  ;;  %v1936_v55 = vunpack.c.h.s8.bf16 %v1916_v42  ;;  %v1952_v54 = vunpack.c.h.s8.bf16 %v1924_v43 }
 0x511   :  { %1775 = vmatpush1.bf16.msra.mxu0 %v1693_v57  ;;  %1857 = vmatpush1.bf16.msra.mxu1 %v1695_v58  ;;  %v1872_v57 = vrot.slane %v2162_v3, %v2579_v39  ;;  %v1880_v58 = vrot.slane %v2605_v33, %v2579_v39 }
 0x512   :  { %1776 = vmatprep.subr.bf16.mxu0 %v1698_v61  ;;  %1858 = vmatprep.subr.bf16.mxu1 %v1700_v44  ;;  %v1876_v61 = vrot.slane %v2163_v60, %v2579_v39  ;;  %v2164_v44 = vld [vmem:[#allocation13 + $0x38] sm:$0xff] }
 0x513   :  { %v1884_v62 = vrot.slane %v2164_v44, %v2579_v39 }
 0x515   :  { %1777 = vmatpush1.bf16.msra.mxu0 %v1697_v49  ;;  %1859 = vmatpush1.bf16.msra.mxu1 %v1699_v1  ;;  %v1892_v49 = vrot.slane %v2165_v63, %v1891_v56  ;;  %v1900_v1 = vrot.slane %v2632_v51, %v1891_v56 }
 0x516   :  { %2068 = vmatprep.subr.bf16.mxu0 %v1937_v6  ;;  %2090 = vmatprep.subr.bf16.mxu1 %v1953_v38  ;;  %v2166_v38 = vld [vmem:[#allocation13 + $0x8] sm:$0xff] }
 0x517   :  { %v1896_v9 = vrot.slane %v2166_v38, %v1891_v56 }
 0x518   :  { %1779 = vmatmul.mubr.bf16.vlgmr.msra.gmra.mrb[16].mxu0 %v1703_v11  ;;  %1861 = vmatmul.mubr.bf16.vlgmr.msra.gmra.mrb[16].mxu1 %v1703_v11 }
 0x519   :  { %2069 = vmatpush3.bf16.msra.mxu0 %v1929_v40  ;;  %2091 = vmatpush3.bf16.msra.mxu1 %v1945_v10  ;;  %v1904_v40 = vrot.slane %v2167_v5, %v1891_v56 }
 0x51a   :  { %2070 = vmatprep.subr.bf16.mxu0 %v1938_v41  ;;  %2092 = vmatprep.subr.bf16.mxu1 %v1954_v12 }
 0x51d   :  { %2071 = vmatpush3.bf16.msra.mxu0 %v1930_v14  ;;  %2093 = vmatpush3.bf16.msra.mxu1 %v1946_v15 }
 0x51e   :  { %2072 = vmatprep.subr.bf16.mxu0 %v1939_v2  ;;  %2094 = vmatprep.subr.bf16.mxu1 %v1955_v16 }
 0x521   :  { %2073 = vmatpush3.bf16.msra.mxu0 %v1931_v18  ;;  %2095 = vmatpush3.bf16.msra.mxu1 %v1947_v19 }
 0x522   :  { %2074 = vmatprep.subr.bf16.mxu0 %v1940_v52  ;;  %2096 = vmatprep.subr.bf16.mxu1 %v1956_v4 }
 0x525   :  { %2075 = vmatpush3.bf16.msra.mxu0 %v1932_v7  ;;  %2097 = vmatpush3.bf16.msra.mxu1 %v1948_v22 }
 0x526   :  { %2076 = vmatprep.subr.bf16.mxu0 %v1941_v23  ;;  %2098 = vmatprep.subr.bf16.mxu1 %v1957_v24  ;;  %v2052_v24 = vsub.s32 5, %v2526_v0 }
 0x529   :  { %2077 = vmatpush3.bf16.msra.mxu0 %v1933_v27  ;;  %2099 = vmatpush3.bf16.msra.mxu1 %v1949_v28 }
 0x52a   :  { %2078 = vmatprep.subr.bf16.mxu0 %v1942_v29  ;;  %2100 = vmatprep.subr.bf16.mxu1 %v1958_v30  ;;  %v2048_v29 = vrot.slane %v2162_v3, %v2613_v59 }
 0x52d   :  { %2079 = vmatpush3.bf16.msra.mxu0 %v1934_v31  ;;  %2101 = vmatpush3.bf16.msra.mxu1 %v1950_v32 }
 0x52e   :  { %2080 = vmatprep.subr.bf16.mxu0 %v1943_v36  ;;  %2102 = vmatprep.subr.bf16.mxu1 %v1959_v37  ;;  %v2053_v36 = vrot.slane %v2165_v63, %v2052_v24 }
 0x531   :  { %2081 = vmatpush3.bf16.msra.mxu0 %v1935_v45  ;;  %2103 = vmatpush3.bf16.msra.mxu1 %v1951_v47 }
 0x532   :  { %2082 = vmatprep.subr.bf16.mxu0 %v1944_v48  ;;  %2104 = vmatprep.subr.bf16.mxu1 %v1960_v53 }
 0x535   :  { %2083 = vmatpush3.bf16.msra.mxu0 %v1936_v55  ;;  %2105 = vmatpush3.bf16.msra.mxu1 %v1952_v54 }
 0x5eb   :  { %v1780_v8 = vpop.f32.mrb[16].mxu0  ;;  %v1862_v6 = vpop.f32.mrb[16].mxu1 }
 0x5ec   :  { %v1885_v10 = vmul.f32 %v1872_v57, %v1780_v8  ;;  %v1887_v11 = vmul.f32 %v1880_v58, %v1862_v6  ;;  %v1782_v41 = vpop.f32.mrb[17].mxu0  ;;  %v1864_v33 = vpop.f32.mrb[17].mxu1 }
 0x5ed   :  { %v1886_v12 = vmul.f32 %v1876_v61, %v1782_v41  ;;  %v1888_v13 = vmul.f32 %v1884_v62, %v1864_v33  ;;  %v1784_v46 = vpop.f32.mrb[18].mxu0  ;;  %v1866_v14 = vpop.f32.mrb[18].mxu1 }
 0x5ee   :  { %v1905_v15 = vadd.f32 %v1892_v49, %v1885_v10  ;;  %v1907_v39 = vadd.f32 %v1900_v1, %v1887_v11  ;;  %v1785_v2 = vpop.f32.mrb[19].mxu0  ;;  %v1867_v16 = vpop.f32.mrb[19].mxu1 }
 0x5ef   :  { %v1906_v17 = vadd.f32 %v1896_v9, %v1886_v12  ;;  %v1908_v51 = vadd.f32 %v1904_v40, %v1888_v13 }
 0x5f0   :  { %v1909_v50 = vmax.f32 %v1905_v15, 0.0  ;;  %v1911_v18 = vmax.f32 %v1907_v39, 0.0 }
 0x5f1   :  { %v1910_v19 = vmax.f32 %v1906_v17, 0.0  ;;  %v1912_v52 = vmax.f32 %v1908_v51, 0.0 }
 0x5f2   :  { %v1961_v21 = vpack.c.bf16 %v1909_v50, %v1909_v50  ;;  %v1963_v7 = vpack.c.bf16 %v1911_v18, %v1911_v18 }
 0x5f3   :  { %v1962_v4 = vpack.c.bf16 %v1910_v19, %v1910_v19  ;;  %v1964_v20 = vpack.c.bf16 %v1912_v52, %v1912_v52 }
 0x5f5   :  { %1997 = vmatprep.mubr.bf16.mxu0 %v1962_v4  ;;  %2037 = vmatprep.mubr.bf16.mxu1 %v1964_v20 }
 0x5f6   :  { %1998 = vmatmul.mubr.bf16.vlgmr.msra.gmra.mrb[20].mxu0 %v1961_v21  ;;  %2038 = vmatmul.mubr.bf16.vlgmr.msra.gmra.mrb[20].mxu1 %v1963_v7 }
 0x6c9   :  { %v2084_v22 = vpop.f32.mrb[20].mxu0  ;;  %v2106_v23 = vpop.f32.mrb[20].mxu1 }
 0x6ca   :  { %v2085_v25 = vpop.f32.mrb[21].mxu0  ;;  %v2107_v26 = vpop.f32.mrb[21].mxu1 }
 0x6cb   :  { %v2086_v27 = vadd.f32 %v2085_v25, %v2084_v22  ;;  %v2108_v28 = vadd.f32 %v2107_v26, %v2106_v23  ;;  %v2087_v30 = vpop.f32.mrb[22].mxu0  ;;  %v2109_v31 = vpop.f32.mrb[22].mxu1 }
 0x6cc   :  { %v2088_v32 = vpop.f32.mrb[23].mxu0  ;;  %v2110_v34 = vpop.f32.mrb[23].mxu1 }
 0x6cd   :  { %v2040_v35 = vadd.f32 %v2108_v28, %v2086_v27 }
 0x6cf   :  { %v2049_v37 = vmul.f32 %v2048_v29, %v2040_v35 }
 0x6d1   :  { %v2054_v42 = vadd.f32 %v2053_v36, %v2049_v37 }
 0x6d3   :  { %2056 = vst.msk [vmem:[%s2656_s8] sm:$0xff] %vm2055_vm1, %v2054_v42 }
 0x6d4   :  { %2061 = vsyncpa [#allocation3], 1 }
 0x6d5   :  { %2062 = vsyncpa [#allocation5], 1 }
 0x6d6   :  { %2063 = vsyncpa [#allocation8], 1 }
 0x6d7   :  { %2064 = vsyncpa [#allocation11], 1 }
 0x6d8   :  { %2065 = vsyncpa [#allocation14], 1 }

</bundles_post_ra>
